<compile_context>
chip_gen: v5e
topology: v5e:2x2
jax: 0.10.0
libtpu: 0.0.40
codegen_flags: <defaults>
</compile_context>

<pallas_src>
import functools

import jax
import jax.numpy as jnp
import numpy as np
from jax.experimental import pallas as pl
from jax.experimental.pallas import tpu as pltpu

LANE = 128  # TPU lane width


def _round_up(x, m):
    return ((x + m - 1) // m) * m


# ------------------------- in-kernel helpers -------------------------

def _layer_norm(x, gamma, beta, eps=1e-6):
    mean = jnp.mean(x, axis=-1, keepdims=True)
    var = jnp.mean(jnp.square(x - mean), axis=-1, keepdims=True)   # biased, like torch LayerNorm
    return (x - mean) * jax.lax.rsqrt(var + eps) * gamma + beta


def _mha(q_in, kv_pad, bias, wq, wk, wv, wo, gamma, beta, attn_ref, *, n_head, d_k, d_v):
    """One MultiHeadAttention sublayer for a single batch element.

    q_in:    (Lq, D)      f32 queries (also the residual)
    kv_pad:  (Lkp, D)     f32 key/value source, seq zero-padded to a lane multiple
    bias:    (Lq, Lkp)    f32 additive mask bias (0 keep / -1e9 masked; padding columns = -1e9)
    wq, wk:  (D, H*d_k)   bf16;  wv: (D, H*d_v) bf16;  wo: (H*d_v, D) bf16
    attn_ref:(1, H, Lq, Lkp) f32 output ref (lane-dense along the key axis)
    """
    scale = 1.0 / (d_k ** 0.5)

    q_bf = q_in.astype(jnp.bfloat16)
    kv_bf = kv_pad.astype(jnp.bfloat16)

    # Fused head-dense projections (MXU N = H*d_k / H*d_v), bf16 inputs, f32 accumulation.
    q_all = jnp.dot(q_bf, wq, preferred_element_type=jnp.float32) * scale   # (Lq,  H*d_k)
    k_all = jnp.dot(kv_bf, wk, preferred_element_type=jnp.float32)          # (Lkp, H*d_k)
    v_all = jnp.dot(kv_bf, wv, preferred_element_type=jnp.float32)          # (Lkp, H*d_v)

    q_all = q_all.astype(jnp.bfloat16)
    k_all = k_all.astype(jnp.bfloat16)
    v_all = v_all.astype(jnp.bfloat16)

    # Per-head scores / softmax / context (unrolled; only one head's scores live at a time).
    # QK^T and P*V contractions are K = d_k / d_v narrow no matter how they are tiled, so this
    # loop costs no MXU utilization vs. a head-batched formulation and keeps peak VMEM low.
    ctx = []
    for h in range(n_head):
        qh = q_all[:, h * d_k:(h + 1) * d_k]            # (Lq,  d_k)
        kh = k_all[:, h * d_k:(h + 1) * d_k]            # (Lkp, d_k)
        vh = v_all[:, h * d_v:(h + 1) * d_v]            # (Lkp, d_v)
        s = jnp.einsum('qd,kd->qk', qh, kh, preferred_element_type=jnp.float32) + bias
        # Additive -1e9 bias == torch masked_fill for any row with >= 1 unmasked key (masked and
        # padded columns underflow to exactly 0); fully-masked rows differ (latent, unexercised).
        p = jnp.exp(s - jnp.max(s, axis=-1, keepdims=True))
        attn = p * pl.reciprocal(jnp.sum(p, axis=-1, keepdims=True), approx=True)
        attn_ref[0, h, :, :] = attn                     # lane-dense store (Lq, Lkp)
        ctx.append(jnp.dot(attn.astype(jnp.bfloat16), vh, preferred_element_type=jnp.float32))

    # concat(heads) @ W_o as a single wide matmul (contraction K = H*d_v).
    ctx = jnp.concatenate(ctx, axis=-1).astype(jnp.bfloat16)                # (Lq, H*d_v)
    out = jnp.dot(ctx, wo, preferred_element_type=jnp.float32) + q_in
    return _layer_norm(out, gamma, beta)


# ------------------------------ kernel ------------------------------

def _decoder_layer_kernel(dec_ref, enc_ref, slf_bias_ref, enc_bias_ref,
                          s_wq, s_wk, s_wv, s_wo, s_g, s_b,
                          e_wq, e_wk, e_wv, e_wo, e_g, e_b,
                          f_w1, f_b1, f_w2, f_b2, f_g, f_b,
                          out_ref, slf_attn_ref, enc_attn_ref,
                          *, n_head, d_k, d_v, lq):
    dec_pad = dec_ref[0]                 # (Lq_pad, D) f32, one batch element
    enc_pad = enc_ref[0]                 # (Lk_pad, D) f32
    q_in = dec_pad[:lq]                  # (Lq, D) queries + residual (static sublane slice)

    # self attention (q = dec rows, k/v = padded dec)
    x = _mha(q_in, dec_pad, slf_bias_ref[0].astype(jnp.float32),
             s_wq[...], s_wk[...], s_wv[...], s_wo[...], s_g[...], s_b[...],
             slf_attn_ref, n_head=n_head, d_k=d_k, d_v=d_v)

    # encoder-decoder attention (q = self-attn output, k/v = padded encoder output)
    x = _mha(x, enc_pad, enc_bias_ref[0].astype(jnp.float32),
             e_wq[...], e_wk[...], e_wv[...], e_wo[...], e_g[...], e_b[...],
             enc_attn_ref, n_head=n_head, d_k=d_k, d_v=d_v)

    # position-wise feed forward (bf16 MXU inputs, f32 accumulation / residual / LayerNorm)
    residual = x
    h1 = jnp.dot(x.astype(jnp.bfloat16), f_w1[...], preferred_element_type=jnp.float32) + f_b1[...]
    h1 = jnp.maximum(h1, 0.0)
    y = jnp.dot(h1.astype(jnp.bfloat16), f_w2[...], preferred_element_type=jnp.float32) + f_b2[...]
    # TODO(synk): with d_model < 128 this store is a masked (non-lane-dense) vst; irrelevant at
    #             production d_model >= 128, otherwise pad/slice the lane dim in the wrapper.
    out_ref[0] = _layer_norm(y + residual, f_g[...], f_b[...])


# ------------------------------ wrapper ------------------------------

def decoder_layer(dec_input, enc_output, slf_mask, enc_mask, params, *, n_head, d_k, d_v):
    (s_wq, s_wk, s_wv, s_fc, s_g, s_b,
     e_wq, e_wk, e_wv, e_fc, e_g, e_b,
     f_w1, f_b1, f_w2, f_b2, f_g, f_b) = params

    B, Lq, D = dec_input.shape
    Lk = enc_output.shape[1]
    Lq_kp = _round_up(Lq, LANE)   # padded key length for self-attention
    Lk_p = _round_up(Lk, LANE)    # padded key length for cross-attention

    f32, bf16 = jnp.float32, jnp.bfloat16

    # K/V sources zero-padded along seq so the score / attention tiles are lane-dense; masks are
    # shipped as bf16 additive biases (-1e9 on masked and padded columns -> exp underflows to 0).
    dec_pad = jnp.pad(dec_input.astype(f32), ((0, 0), (0, Lq_kp - Lq), (0, 0)))
    enc_pad = jnp.pad(enc_output.astype(f32), ((0, 0), (0, Lk_p - Lk), (0, 0)))
    slf_bias = jnp.where(jnp.pad(slf_mask, ((0, 0), (0, 0), (0, Lq_kp - Lq))) == 0,
                         -1e9, 0.0).astype(bf16)
    enc_bias = jnp.where(jnp.pad(enc_mask, ((0, 0), (0, 0), (0, Lk_p - Lk))) == 0,
                         -1e9, 0.0).astype(bf16)

    as_bf = lambda w: w.astype(bf16)   # bf16 MXU operands; LayerNorm/bias params stay f32
    inputs = (dec_pad, enc_pad, slf_bias, enc_bias,
              as_bf(s_wq), as_bf(s_wk), as_bf(s_wv), as_bf(s_fc), s_g, s_b,
              as_bf(e_wq), as_bf(e_wk), as_bf(e_wv), as_bf(e_fc), e_g, e_b,
              as_bf(f_w1), f_b1, as_bf(f_w2), f_b2, f_g, f_b)

    def batch_spec(shape):                     # one batch element per grid step
        nd = len(shape)

        def idx(b):
            return (b,) + (0,) * (nd - 1)
        return pl.BlockSpec((1,) + tuple(shape[1:]), idx)

    def rep_spec(arr):                         # weights: same block every step (no re-DMA)
        zeros = (0,) * arr.ndim

        def idx(b):
            return zeros
        return pl.BlockSpec(arr.shape, idx)

    in_specs = ([batch_spec(dec_pad.shape), batch_spec(enc_pad.shape),
                 batch_spec(slf_bias.shape), batch_spec(enc_bias.shape)]
                + [rep_spec(a) for a in inputs[4:]])

    out_shapes = (jax.ShapeDtypeStruct((B, Lq, D), f32),
                  jax.ShapeDtypeStruct((B, n_head, Lq, Lq_kp), f32),
                  jax.ShapeDtypeStruct((B, n_head, Lq, Lk_p), f32))
    out_specs = (pl.BlockSpec((1, Lq, D), lambda b: (b, 0, 0)),
                 pl.BlockSpec((1, n_head, Lq, Lq_kp), lambda b: (b, 0, 0, 0)),
                 pl.BlockSpec((1, n_head, Lq, Lk_p), lambda b: (b, 0, 0, 0)))

    kernel = functools.partial(_decoder_layer_kernel,
                               n_head=n_head, d_k=d_k, d_v=d_v, lq=Lq)

    out, slf_attn_p, enc_attn_p = pl.pallas_call(
        kernel,
        out_shape=out_shapes,
        grid_spec=pltpu.PrefetchScalarGridSpec(
            num_scalar_prefetch=0,
            grid=(B,),                                   # one batch element per grid step
            in_specs=in_specs,
            out_specs=out_specs),
        compiler_params=pltpu.CompilerParams(
            dimension_semantics=("parallel",),           # megacore-shard the batch on v7x
            vmem_limit_bytes=48 * 1024 * 1024),
    )(*inputs)

    # attention maps already come out in (B, H, Lq, Lk_pad) order; just drop the lane padding
    return out, slf_attn_p[..., :Lq], enc_attn_p[..., :Lk]


# --------------------------- pure-JAX reference ---------------------------

def _ref_ln(x, g, b, eps=1e-6):
    mean = jnp.mean(x, axis=-1, keepdims=True)
    var = jnp.mean(jnp.square(x - mean), axis=-1, keepdims=True)
    return (x - mean) / jnp.sqrt(var + eps) * g + b


def _ref_mha(q_in, kv_in, mask, wq, wk, wv, wfc, g, b, n_head, d_k, d_v):
    B, Lq, D = q_in.shape
    Lk = kv_in.shape[1]
    q = (q_in @ wq).reshape(B, Lq, n_head, d_k).transpose(0, 2, 1, 3)
    k = (kv_in @ wk).reshape(B, Lk, n_head, d_k).transpose(0, 2, 1, 3)
    v = (kv_in @ wv).reshape(B, Lk, n_head, d_v).transpose(0, 2, 1, 3)
    scores = jnp.einsum('bhqd,bhkd->bhqk', q, k) / (d_k ** 0.5)
    scores = jnp.where(mask[:, None] == 0, -1e9, scores)
    attn = jax.nn.softmax(scores, axis=-1)
    o = jnp.einsum('bhqk,bhkd->bhqd', attn, v).transpose(0, 2, 1, 3).reshape(B, Lq, n_head * d_v)
    o = o @ wfc + q_in
    return _ref_ln(o, g, b), attn


def decoder_layer_ref(dec, enc, slf_mask, enc_mask, params, *, n_head, d_k, d_v):
    (s_wq, s_wk, s_wv, s_fc, s_g, s_b,
     e_wq, e_wk, e_wv, e_fc, e_g, e_b,
     f_w1, f_b1, f_w2, f_b2, f_g, f_b) = params
    x, a1 = _ref_mha(dec, dec, slf_mask, s_wq, s_wk, s_wv, s_fc, s_g, s_b, n_head, d_k, d_v)
    x, a2 = _ref_mha(x, enc, enc_mask, e_wq, e_wk, e_wv, e_fc, e_g, e_b, n_head, d_k, d_v)
    residual = x
    h = jnp.maximum(x @ f_w1 + f_b1, 0.0)
    y = h @ f_w2 + f_b2 + residual
    return _ref_ln(y, f_g, f_b), a1, a2


# ------------------------------- main -------------------------------

if __name__ == "__main__":
    B, Lq, Lk = 2, 8, 10
    d_model, d_inner, n_head, d_k, d_v = 32, 64, 2, 16, 16

    key = jax.random.PRNGKey(0)
    ks = jax.random.split(key, 16)

    def w(k, shape, scale=0.1):
        return (scale * jax.random.normal(k, shape)).astype(jnp.float32)

    # parameters (deterministic synthetic init); dropout is identity (eval mode)
    params = [
        # self-attention
        w(ks[0], (d_model, n_head * d_k)), w(ks[1], (d_model, n_head * d_k)),
        w(ks[2], (d_model, n_head * d_v)), w(ks[3], (n_head * d_v, d_model)),
        jnp.ones((1, d_model), jnp.float32), jnp.zeros((1, d_model), jnp.float32),
        # encoder-decoder attention
        w(ks[4], (d_model, n_head * d_k)), w(ks[5], (d_model, n_head * d_k)),
        w(ks[6], (d_model, n_head * d_v)), w(ks[7], (n_head * d_v, d_model)),
        jnp.ones((1, d_model), jnp.float32), jnp.zeros((1, d_model), jnp.float32),
        # position-wise FFN
        w(ks[8], (d_model, d_inner)), w(ks[9], (1, d_inner), 0.01),
        w(ks[10], (d_inner, d_model)), w(ks[11], (1, d_model), 0.01),
        jnp.ones((1, d_model), jnp.float32), jnp.zeros((1, d_model), jnp.float32),
    ]

    dec_input = w(ks[12], (B, Lq, d_model), 1.0)
    enc_output = w(ks[13], (B, Lk, d_model), 1.0)
    # masks: 1 = keep, 0 = masked (torch masked_fill(mask == 0, -1e9))
    slf_mask = jnp.broadcast_to(jnp.tril(jnp.ones((Lq, Lq), jnp.float32)), (B, Lq, Lq))
    enc_mask = jnp.ones((B, Lq, Lk), jnp.float32)

    out, slf_attn, enc_attn = decoder_layer(
        dec_input, enc_output, slf_mask, enc_mask, params,
        n_head=n_head, d_k=d_k, d_v=d_v)
    out = jax.block_until_ready(out)

    out_r, slf_r, enc_r = decoder_layer_ref(
        dec_input, enc_output, slf_mask, enc_mask, params,
        n_head=n_head, d_k=d_k, d_v=d_v)

    # The kernel feeds bf16 operands to the MXU (f32 accumulation) and uses the EUP approximate
    # reciprocal for the softmax denominator, while the reference is pure f32: tolerances cover
    # bf16 input rounding (~2^-9 relative) compounded through three sublayers.
    np.testing.assert_allclose(np.asarray(slf_attn), np.asarray(slf_r), rtol=1e-2, atol=1e-2)
    np.testing.assert_allclose(np.asarray(enc_attn), np.asarray(enc_r), rtol=1e-2, atol=1e-2)
    np.testing.assert_allclose(np.asarray(out), np.asarray(out_r), rtol=3e-2, atol=3e-2)

    print("KERNEL_OK")
</pallas_src>

<mosaic_0001>
module attributes {stable_mosaic.version = 11 : i64} {
  func.func @_decoder_layer_kernel(%arg0: i32, %arg1: memref<1x128x32xf32, #tpu.memory_space<vmem>>, %arg2: memref<1x128x32xf32, #tpu.memory_space<vmem>>, %arg3: memref<1x8x128xbf16, #tpu.memory_space<vmem>>, %arg4: memref<1x8x128xbf16, #tpu.memory_space<vmem>>, %arg5: memref<32x32xbf16, #tpu.memory_space<vmem>>, %arg6: memref<32x32xbf16, #tpu.memory_space<vmem>>, %arg7: memref<32x32xbf16, #tpu.memory_space<vmem>>, %arg8: memref<32x32xbf16, #tpu.memory_space<vmem>>, %arg9: memref<1x32xf32, #tpu.memory_space<vmem>>, %arg10: memref<1x32xf32, #tpu.memory_space<vmem>>, %arg11: memref<32x32xbf16, #tpu.memory_space<vmem>>, %arg12: memref<32x32xbf16, #tpu.memory_space<vmem>>, %arg13: memref<32x32xbf16, #tpu.memory_space<vmem>>, %arg14: memref<32x32xbf16, #tpu.memory_space<vmem>>, %arg15: memref<1x32xf32, #tpu.memory_space<vmem>>, %arg16: memref<1x32xf32, #tpu.memory_space<vmem>>, %arg17: memref<32x64xbf16, #tpu.memory_space<vmem>>, %arg18: memref<1x64xf32, #tpu.memory_space<vmem>>, %arg19: memref<64x32xbf16, #tpu.memory_space<vmem>>, %arg20: memref<1x32xf32, #tpu.memory_space<vmem>>, %arg21: memref<1x32xf32, #tpu.memory_space<vmem>>, %arg22: memref<1x32xf32, #tpu.memory_space<vmem>>, %arg23: memref<1x8x32xf32, #tpu.memory_space<vmem>>, %arg24: memref<1x2x8x128xf32, #tpu.memory_space<vmem>>, %arg25: memref<1x2x8x128xf32, #tpu.memory_space<vmem>>) attributes {dimension_semantics = [#tpu.dimension_semantics<parallel>], iteration_bounds = array<i64: 2>, scalar_prefetch = 0 : i64, scratch_operands = 0 : i64, tpu.core_type = #tpu.core_type<tc>, window_params = [{transform_indices = @transform_0, window_bounds = array<i64: 1, 128, 32>}, {transform_indices = @transform_1, window_bounds = array<i64: 1, 128, 32>}, {transform_indices = @transform_2, window_bounds = array<i64: 1, 8, 128>}, {transform_indices = @transform_3, window_bounds = array<i64: 1, 8, 128>}, {pipeline_mode = #tpu.pipeline_mode<synchronous>, transform_indices = @transform_4, window_bounds = array<i64: 32, 32>}, {pipeline_mode = #tpu.pipeline_mode<synchronous>, transform_indices = @transform_5, window_bounds = array<i64: 32, 32>}, {pipeline_mode = #tpu.pipeline_mode<synchronous>, transform_indices = @transform_6, window_bounds = array<i64: 32, 32>}, {pipeline_mode = #tpu.pipeline_mode<synchronous>, transform_indices = @transform_7, window_bounds = array<i64: 32, 32>}, {pipeline_mode = #tpu.pipeline_mode<synchronous>, transform_indices = @transform_8, window_bounds = array<i64: 1, 32>}, {pipeline_mode = #tpu.pipeline_mode<synchronous>, transform_indices = @transform_9, window_bounds = array<i64: 1, 32>}, {pipeline_mode = #tpu.pipeline_mode<synchronous>, transform_indices = @transform_10, window_bounds = array<i64: 32, 32>}, {pipeline_mode = #tpu.pipeline_mode<synchronous>, transform_indices = @transform_11, window_bounds = array<i64: 32, 32>}, {pipeline_mode = #tpu.pipeline_mode<synchronous>, transform_indices = @transform_12, window_bounds = array<i64: 32, 32>}, {pipeline_mode = #tpu.pipeline_mode<synchronous>, transform_indices = @transform_13, window_bounds = array<i64: 32, 32>}, {pipeline_mode = #tpu.pipeline_mode<synchronous>, transform_indices = @transform_14, window_bounds = array<i64: 1, 32>}, {pipeline_mode = #tpu.pipeline_mode<synchronous>, transform_indices = @transform_15, window_bounds = array<i64: 1, 32>}, {pipeline_mode = #tpu.pipeline_mode<synchronous>, transform_indices = @transform_16, window_bounds = array<i64: 32, 64>}, {pipeline_mode = #tpu.pipeline_mode<synchronous>, transform_indices = @transform_17, window_bounds = array<i64: 1, 64>}, {pipeline_mode = #tpu.pipeline_mode<synchronous>, transform_indices = @transform_18, window_bounds = array<i64: 64, 32>}, {pipeline_mode = #tpu.pipeline_mode<synchronous>, transform_indices = @transform_19, window_bounds = array<i64: 1, 32>}, {pipeline_mode = #tpu.pipeline_mode<synchronous>, transform_indices = @transform_20, window_bounds = array<i64: 1, 32>}, {pipeline_mode = #tpu.pipeline_mode<synchronous>, transform_indices = @transform_21, window_bounds = array<i64: 1, 32>}, {transform_indices = @transform_22, window_bounds = array<i64: 1, 8, 32>}, {transform_indices = @transform_23, window_bounds = array<i64: 1, 2, 8, 128>}, {transform_indices = @transform_24, window_bounds = array<i64: 1, 2, 8, 128>}]} {
    %c0 = arith.constant 0 : index
    %c0_0 = arith.constant 0 : index
    %c0_1 = arith.constant 0 : index
    %0 = vector.load %arg1[%c0, %c0_0, %c0_1] : memref<1x128x32xf32, #tpu.memory_space<vmem>>, vector<1x128x32xf32>
    %1 = vector.shape_cast %0 : vector<1x128x32xf32> to vector<128x32xf32>
    %c0_2 = arith.constant 0 : index
    %c0_3 = arith.constant 0 : index
    %c0_4 = arith.constant 0 : index
    %2 = vector.load %arg2[%c0_2, %c0_3, %c0_4] : memref<1x128x32xf32, #tpu.memory_space<vmem>>, vector<1x128x32xf32>
    %3 = vector.shape_cast %2 : vector<1x128x32xf32> to vector<128x32xf32>
    %4 = vector.extract_strided_slice %1 {offsets = [0, 0], sizes = [8, 32], strides = [1, 1]} : vector<128x32xf32> to vector<8x32xf32>
    %c0_5 = arith.constant 0 : index
    %c0_6 = arith.constant 0 : index
    %c0_7 = arith.constant 0 : index
    %5 = vector.load %arg3[%c0_5, %c0_6, %c0_7] : memref<1x8x128xbf16, #tpu.memory_space<vmem>>, vector<1x8x128xbf16>
    %6 = vector.shape_cast %5 : vector<1x8x128xbf16> to vector<8x128xbf16>
    %7 = arith.extf %6 : vector<8x128xbf16> to vector<8x128xf32>
    %c0_8 = arith.constant 0 : index
    %c0_9 = arith.constant 0 : index
    %8 = vector.load %arg5[%c0_8, %c0_9] : memref<32x32xbf16, #tpu.memory_space<vmem>>, vector<32x32xbf16>
    %c0_10 = arith.constant 0 : index
    %c0_11 = arith.constant 0 : index
    %9 = vector.load %arg6[%c0_10, %c0_11] : memref<32x32xbf16, #tpu.memory_space<vmem>>, vector<32x32xbf16>
    %c0_12 = arith.constant 0 : index
    %c0_13 = arith.constant 0 : index
    %10 = vector.load %arg7[%c0_12, %c0_13] : memref<32x32xbf16, #tpu.memory_space<vmem>>, vector<32x32xbf16>
    %c0_14 = arith.constant 0 : index
    %c0_15 = arith.constant 0 : index
    %11 = vector.load %arg8[%c0_14, %c0_15] : memref<32x32xbf16, #tpu.memory_space<vmem>>, vector<32x32xbf16>
    %c0_16 = arith.constant 0 : index
    %c0_17 = arith.constant 0 : index
    %12 = vector.load %arg9[%c0_16, %c0_17] : memref<1x32xf32, #tpu.memory_space<vmem>>, vector<1x32xf32>
    %c0_18 = arith.constant 0 : index
    %c0_19 = arith.constant 0 : index
    %13 = vector.load %arg10[%c0_18, %c0_19] : memref<1x32xf32, #tpu.memory_space<vmem>>, vector<1x32xf32>
    %14 = arith.truncf %4 : vector<8x32xf32> to vector<8x32xbf16>
    %15 = arith.truncf %1 : vector<128x32xf32> to vector<128x32xbf16>
    %cst = arith.constant dense<0.000000e+00> : vector<8x32xf32>
    %16 = tpu.matmul %14, %8, %cst {dimension_numbers = #tpu.dot_dimension_numbers<[1], [0], [0], [1], [0, 0, 1, 1], [], []>} : vector<8x32xbf16>, vector<32x32xbf16>, vector<8x32xf32> -> vector<8x32xf32>
    %cst_20 = arith.constant 2.500000e-01 : f32
    %17 = vector.broadcast %cst_20 : f32 to vector<8x32xf32>
    %18 = arith.mulf %16, %17 : vector<8x32xf32>
    %cst_21 = arith.constant dense<0.000000e+00> : vector<128x32xf32>
    %19 = tpu.matmul %15, %9, %cst_21 {dimension_numbers = #tpu.dot_dimension_numbers<[1], [0], [0], [1], [0, 0, 1, 1], [], []>} : vector<128x32xbf16>, vector<32x32xbf16>, vector<128x32xf32> -> vector<128x32xf32>
    %cst_22 = arith.constant dense<0.000000e+00> : vector<128x32xf32>
    %20 = tpu.matmul %15, %10, %cst_22 {dimension_numbers = #tpu.dot_dimension_numbers<[1], [0], [0], [1], [0, 0, 1, 1], [], []>} : vector<128x32xbf16>, vector<32x32xbf16>, vector<128x32xf32> -> vector<128x32xf32>
    %21 = arith.truncf %18 : vector<8x32xf32> to vector<8x32xbf16>
    %22 = arith.truncf %19 : vector<128x32xf32> to vector<128x32xbf16>
    %23 = arith.truncf %20 : vector<128x32xf32> to vector<128x32xbf16>
    %24 = vector.extract_strided_slice %21 {offsets = [0, 0], sizes = [8, 16], strides = [1, 1]} : vector<8x32xbf16> to vector<8x16xbf16>
    %25 = vector.extract_strided_slice %22 {offsets = [0, 0], sizes = [128, 16], strides = [1, 1]} : vector<128x32xbf16> to vector<128x16xbf16>
    %26 = vector.extract_strided_slice %23 {offsets = [0, 0], sizes = [128, 16], strides = [1, 1]} : vector<128x32xbf16> to vector<128x16xbf16>
    "tpu.trace_start"() <{level = 10 : i32, message = "qd,kd->qk"}> : () -> ()
    %cst_23 = arith.constant dense<0.000000e+00> : vector<8x128xf32>
    %27 = tpu.matmul %24, %25, %cst_23 {dimension_numbers = #tpu.dot_dimension_numbers<[1], [1], [0], [0], [0, 0, 1, 0], [], []>} : vector<8x16xbf16>, vector<128x16xbf16>, vector<8x128xf32> -> vector<8x128xf32>
    "tpu.trace_stop"() : () -> ()
    %28 = arith.addf %27, %7 : vector<8x128xf32>
    %cst_24 = arith.constant dense<0xFF800000> : vector<8xf32>
    %29 = vector.multi_reduction <maximumf>, %28, %cst_24 [1] : vector<8x128xf32> to vector<8xf32>
    %30 = vector.shape_cast %29 : vector<8xf32> to vector<8x1xf32>
    %31 = vector.broadcast %30 : vector<8x1xf32> to vector<8x128xf32>
    %32 = arith.subf %28, %31 : vector<8x128xf32>
    %33 = math.exp %32 : vector<8x128xf32>
    %cst_25 = arith.constant dense<0.000000e+00> : vector<8xf32>
    %34 = vector.multi_reduction <add>, %33, %cst_25 [1] : vector<8x128xf32> to vector<8xf32>
    %35 = vector.shape_cast %34 : vector<8xf32> to vector<8x1xf32>
    %36 = tpu.reciprocal %35 {approx = true} : vector<8x1xf32> -> vector<8x1xf32>
    %37 = vector.broadcast %36 : vector<8x1xf32> to vector<8x128xf32>
    %38 = arith.mulf %33, %37 : vector<8x128xf32>
    %c0_26 = arith.constant 0 : index
    %c0_27 = arith.constant 0 : index
    %c0_28 = arith.constant 0 : index
    %c0_29 = arith.constant 0 : index
    %39 = vector.load %arg24[%c0_26, %c0_27, %c0_28, %c0_29] : memref<1x2x8x128xf32, #tpu.memory_space<vmem>>, vector<1x1x8x128xf32>
    %40 = vector.shape_cast %39 : vector<1x1x8x128xf32> to vector<8x128xf32>
    %41 = vector.shape_cast %38 : vector<8x128xf32> to vector<1x1x8x128xf32>
    tpu.vector_store %arg24[%c0_26, %c0_27, %c0_28, %c0_29], %41 {strides = array<i32>} : memref<1x2x8x128xf32, #tpu.memory_space<vmem>>, vector<1x1x8x128xf32>,
    %42 = arith.truncf %38 : vector<8x128xf32> to vector<8x128xbf16>
    %cst_30 = arith.constant dense<0.000000e+00> : vector<8x16xf32>
    %43 = tpu.matmul %42, %26, %cst_30 {dimension_numbers = #tpu.dot_dimension_numbers<[1], [0], [0], [1], [0, 0, 1, 1], [], []>} : vector<8x128xbf16>, vector<128x16xbf16>, vector<8x16xf32> -> vector<8x16xf32>
    %44 = vector.extract_strided_slice %21 {offsets = [0, 16], sizes = [8, 16], strides = [1, 1]} : vector<8x32xbf16> to vector<8x16xbf16>
    %45 = vector.extract_strided_slice %22 {offsets = [0, 16], sizes = [128, 16], strides = [1, 1]} : vector<128x32xbf16> to vector<128x16xbf16>
    %46 = vector.extract_strided_slice %23 {offsets = [0, 16], sizes = [128, 16], strides = [1, 1]} : vector<128x32xbf16> to vector<128x16xbf16>
    "tpu.trace_start"() <{level = 10 : i32, message = "qd,kd->qk"}> : () -> ()
    %cst_31 = arith.constant dense<0.000000e+00> : vector<8x128xf32>
    %47 = tpu.matmul %44, %45, %cst_31 {dimension_numbers = #tpu.dot_dimension_numbers<[1], [1], [0], [0], [0, 0, 1, 0], [], []>} : vector<8x16xbf16>, vector<128x16xbf16>, vector<8x128xf32> -> vector<8x128xf32>
    "tpu.trace_stop"() : () -> ()
    %48 = arith.addf %47, %7 : vector<8x128xf32>
    %cst_32 = arith.constant dense<0xFF800000> : vector<8xf32>
    %49 = vector.multi_reduction <maximumf>, %48, %cst_32 [1] : vector<8x128xf32> to vector<8xf32>
    %50 = vector.shape_cast %49 : vector<8xf32> to vector<8x1xf32>
    %51 = vector.broadcast %50 : vector<8x1xf32> to vector<8x128xf32>
    %52 = arith.subf %48, %51 : vector<8x128xf32>
    %53 = math.exp %52 : vector<8x128xf32>
    %cst_33 = arith.constant dense<0.000000e+00> : vector<8xf32>
    %54 = vector.multi_reduction <add>, %53, %cst_33 [1] : vector<8x128xf32> to vector<8xf32>
    %55 = vector.shape_cast %54 : vector<8xf32> to vector<8x1xf32>
    %56 = tpu.reciprocal %55 {approx = true} : vector<8x1xf32> -> vector<8x1xf32>
    %57 = vector.broadcast %56 : vector<8x1xf32> to vector<8x128xf32>
    %58 = arith.mulf %53, %57 : vector<8x128xf32>
    %c0_34 = arith.constant 0 : index
    %c1 = arith.constant 1 : index
    %c0_35 = arith.constant 0 : index
    %c0_36 = arith.constant 0 : index
    %59 = vector.load %arg24[%c0_34, %c1, %c0_35, %c0_36] : memref<1x2x8x128xf32, #tpu.memory_space<vmem>>, vector<1x1x8x128xf32>
    %60 = vector.shape_cast %59 : vector<1x1x8x128xf32> to vector<8x128xf32>
    %61 = vector.shape_cast %58 : vector<8x128xf32> to vector<1x1x8x128xf32>
    tpu.vector_store %arg24[%c0_34, %c1, %c0_35, %c0_36], %61 {strides = array<i32>} : memref<1x2x8x128xf32, #tpu.memory_space<vmem>>, vector<1x1x8x128xf32>,
    %62 = arith.truncf %58 : vector<8x128xf32> to vector<8x128xbf16>
    %cst_37 = arith.constant dense<0.000000e+00> : vector<8x16xf32>
    %63 = tpu.matmul %62, %46, %cst_37 {dimension_numbers = #tpu.dot_dimension_numbers<[1], [0], [0], [1], [0, 0, 1, 1], [], []>} : vector<8x128xbf16>, vector<128x16xbf16>, vector<8x16xf32> -> vector<8x16xf32>
    %64 = tpu.concatenate %43, %63 in 1 : vector<8x16xf32>, vector<8x16xf32> -> vector<8x32xf32>
    %65 = arith.truncf %64 : vector<8x32xf32> to vector<8x32xbf16>
    %cst_38 = arith.constant dense<0.000000e+00> : vector<8x32xf32>
    %66 = tpu.matmul %65, %11, %cst_38 {dimension_numbers = #tpu.dot_dimension_numbers<[1], [0], [0], [1], [0, 0, 1, 1], [], []>} : vector<8x32xbf16>, vector<32x32xbf16>, vector<8x32xf32> -> vector<8x32xf32>
    %67 = arith.addf %66, %4 : vector<8x32xf32>
    %cst_39 = arith.constant dense<0.000000e+00> : vector<8xf32>
    %68 = vector.multi_reduction <add>, %67, %cst_39 [1] : vector<8x32xf32> to vector<8xf32>
    %69 = vector.shape_cast %68 : vector<8xf32> to vector<8x1xf32>
    %cst_40 = arith.constant 3.200000e+01 : f32
    %70 = vector.broadcast %cst_40 : f32 to vector<8x1xf32>
    %71 = arith.divf %69, %70 : vector<8x1xf32>
    %72 = vector.broadcast %71 : vector<8x1xf32> to vector<8x32xf32>
    %73 = arith.subf %67, %72 : vector<8x32xf32>
    %74 = arith.mulf %73, %73 : vector<8x32xf32>
    %cst_41 = arith.constant dense<0.000000e+00> : vector<8xf32>
    %75 = vector.multi_reduction <add>, %74, %cst_41 [1] : vector<8x32xf32> to vector<8xf32>
    %76 = vector.shape_cast %75 : vector<8xf32> to vector<8x1xf32>
    %cst_42 = arith.constant 3.200000e+01 : f32
    %77 = vector.broadcast %cst_42 : f32 to vector<8x1xf32>
    %78 = arith.divf %76, %77 : vector<8x1xf32>
    %79 = vector.broadcast %71 : vector<8x1xf32> to vector<8x32xf32>
    %80 = arith.subf %67, %79 : vector<8x32xf32>
    %cst_43 = arith.constant 9.99999997E-7 : f32
    %81 = vector.broadcast %cst_43 : f32 to vector<8x1xf32>
    %82 = arith.addf %78, %81 : vector<8x1xf32>
    %83 = math.rsqrt %82 : vector<8x1xf32>
    %84 = vector.broadcast %83 : vector<8x1xf32> to vector<8x32xf32>
    %85 = arith.mulf %80, %84 : vector<8x32xf32>
    %86 = vector.broadcast %12 : vector<1x32xf32> to vector<8x32xf32>
    %87 = arith.mulf %85, %86 : vector<8x32xf32>
    %88 = vector.broadcast %13 : vector<1x32xf32> to vector<8x32xf32>
    %89 = arith.addf %87, %88 : vector<8x32xf32>
    %c0_44 = arith.constant 0 : index
    %c0_45 = arith.constant 0 : index
    %c0_46 = arith.constant 0 : index
    %90 = vector.load %arg4[%c0_44, %c0_45, %c0_46] : memref<1x8x128xbf16, #tpu.memory_space<vmem>>, vector<1x8x128xbf16>
    %91 = vector.shape_cast %90 : vector<1x8x128xbf16> to vector<8x128xbf16>
    %92 = arith.extf %91 : vector<8x128xbf16> to vector<8x128xf32>
    %c0_47 = arith.constant 0 : index
    %c0_48 = arith.constant 0 : index
    %93 = vector.load %arg11[%c0_47, %c0_48] : memref<32x32xbf16, #tpu.memory_space<vmem>>, vector<32x32xbf16>
    %c0_49 = arith.constant 0 : index
    %c0_50 = arith.constant 0 : index
    %94 = vector.load %arg12[%c0_49, %c0_50] : memref<32x32xbf16, #tpu.memory_space<vmem>>, vector<32x32xbf16>
    %c0_51 = arith.constant 0 : index
    %c0_52 = arith.constant 0 : index
    %95 = vector.load %arg13[%c0_51, %c0_52] : memref<32x32xbf16, #tpu.memory_space<vmem>>, vector<32x32xbf16>
    %c0_53 = arith.constant 0 : index
    %c0_54 = arith.constant 0 : index
    %96 = vector.load %arg14[%c0_53, %c0_54] : memref<32x32xbf16, #tpu.memory_space<vmem>>, vector<32x32xbf16>
    %c0_55 = arith.constant 0 : index
    %c0_56 = arith.constant 0 : index
    %97 = vector.load %arg15[%c0_55, %c0_56] : memref<1x32xf32, #tpu.memory_space<vmem>>, vector<1x32xf32>
    %c0_57 = arith.constant 0 : index
    %c0_58 = arith.constant 0 : index
    %98 = vector.load %arg16[%c0_57, %c0_58] : memref<1x32xf32, #tpu.memory_space<vmem>>, vector<1x32xf32>
    %99 = arith.truncf %89 : vector<8x32xf32> to vector<8x32xbf16>
    %100 = arith.truncf %3 : vector<128x32xf32> to vector<128x32xbf16>
    %cst_59 = arith.constant dense<0.000000e+00> : vector<8x32xf32>
    %101 = tpu.matmul %99, %93, %cst_59 {dimension_numbers = #tpu.dot_dimension_numbers<[1], [0], [0], [1], [0, 0, 1, 1], [], []>} : vector<8x32xbf16>, vector<32x32xbf16>, vector<8x32xf32> -> vector<8x32xf32>
    %cst_60 = arith.constant 2.500000e-01 : f32
    %102 = vector.broadcast %cst_60 : f32 to vector<8x32xf32>
    %103 = arith.mulf %101, %102 : vector<8x32xf32>
    %cst_61 = arith.constant dense<0.000000e+00> : vector<128x32xf32>
    %104 = tpu.matmul %100, %94, %cst_61 {dimension_numbers = #tpu.dot_dimension_numbers<[1], [0], [0], [1], [0, 0, 1, 1], [], []>} : vector<128x32xbf16>, vector<32x32xbf16>, vector<128x32xf32> -> vector<128x32xf32>
    %cst_62 = arith.constant dense<0.000000e+00> : vector<128x32xf32>
    %105 = tpu.matmul %100, %95, %cst_62 {dimension_numbers = #tpu.dot_dimension_numbers<[1], [0], [0], [1], [0, 0, 1, 1], [], []>} : vector<128x32xbf16>, vector<32x32xbf16>, vector<128x32xf32> -> vector<128x32xf32>
    %106 = arith.truncf %103 : vector<8x32xf32> to vector<8x32xbf16>
    %107 = arith.truncf %104 : vector<128x32xf32> to vector<128x32xbf16>
    %108 = arith.truncf %105 : vector<128x32xf32> to vector<128x32xbf16>
    %109 = vector.extract_strided_slice %106 {offsets = [0, 0], sizes = [8, 16], strides = [1, 1]} : vector<8x32xbf16> to vector<8x16xbf16>
    %110 = vector.extract_strided_slice %107 {offsets = [0, 0], sizes = [128, 16], strides = [1, 1]} : vector<128x32xbf16> to vector<128x16xbf16>
    %111 = vector.extract_strided_slice %108 {offsets = [0, 0], sizes = [128, 16], strides = [1, 1]} : vector<128x32xbf16> to vector<128x16xbf16>
    "tpu.trace_start"() <{level = 10 : i32, message = "qd,kd->qk"}> : () -> ()
    %cst_63 = arith.constant dense<0.000000e+00> : vector<8x128xf32>
    %112 = tpu.matmul %109, %110, %cst_63 {dimension_numbers = #tpu.dot_dimension_numbers<[1], [1], [0], [0], [0, 0, 1, 0], [], []>} : vector<8x16xbf16>, vector<128x16xbf16>, vector<8x128xf32> -> vector<8x128xf32>
    "tpu.trace_stop"() : () -> ()
    %113 = arith.addf %112, %92 : vector<8x128xf32>
    %cst_64 = arith.constant dense<0xFF800000> : vector<8xf32>
    %114 = vector.multi_reduction <maximumf>, %113, %cst_64 [1] : vector<8x128xf32> to vector<8xf32>
    %115 = vector.shape_cast %114 : vector<8xf32> to vector<8x1xf32>
    %116 = vector.broadcast %115 : vector<8x1xf32> to vector<8x128xf32>
    %117 = arith.subf %113, %116 : vector<8x128xf32>
    %118 = math.exp %117 : vector<8x128xf32>
    %cst_65 = arith.constant dense<0.000000e+00> : vector<8xf32>
    %119 = vector.multi_reduction <add>, %118, %cst_65 [1] : vector<8x128xf32> to vector<8xf32>
    %120 = vector.shape_cast %119 : vector<8xf32> to vector<8x1xf32>
    %121 = tpu.reciprocal %120 {approx = true} : vector<8x1xf32> -> vector<8x1xf32>
    %122 = vector.broadcast %121 : vector<8x1xf32> to vector<8x128xf32>
    %123 = arith.mulf %118, %122 : vector<8x128xf32>
    %c0_66 = arith.constant 0 : index
    %c0_67 = arith.constant 0 : index
    %c0_68 = arith.constant 0 : index
    %c0_69 = arith.constant 0 : index
    %124 = vector.load %arg25[%c0_66, %c0_67, %c0_68, %c0_69] : memref<1x2x8x128xf32, #tpu.memory_space<vmem>>, vector<1x1x8x128xf32>
    %125 = vector.shape_cast %124 : vector<1x1x8x128xf32> to vector<8x128xf32>
    %126 = vector.shape_cast %123 : vector<8x128xf32> to vector<1x1x8x128xf32>
    tpu.vector_store %arg25[%c0_66, %c0_67, %c0_68, %c0_69], %126 {strides = array<i32>} : memref<1x2x8x128xf32, #tpu.memory_space<vmem>>, vector<1x1x8x128xf32>,
    %127 = arith.truncf %123 : vector<8x128xf32> to vector<8x128xbf16>
    %cst_70 = arith.constant dense<0.000000e+00> : vector<8x16xf32>
    %128 = tpu.matmul %127, %111, %cst_70 {dimension_numbers = #tpu.dot_dimension_numbers<[1], [0], [0], [1], [0, 0, 1, 1], [], []>} : vector<8x128xbf16>, vector<128x16xbf16>, vector<8x16xf32> -> vector<8x16xf32>
    %129 = vector.extract_strided_slice %106 {offsets = [0, 16], sizes = [8, 16], strides = [1, 1]} : vector<8x32xbf16> to vector<8x16xbf16>
    %130 = vector.extract_strided_slice %107 {offsets = [0, 16], sizes = [128, 16], strides = [1, 1]} : vector<128x32xbf16> to vector<128x16xbf16>
    %131 = vector.extract_strided_slice %108 {offsets = [0, 16], sizes = [128, 16], strides = [1, 1]} : vector<128x32xbf16> to vector<128x16xbf16>
    "tpu.trace_start"() <{level = 10 : i32, message = "qd,kd->qk"}> : () -> ()
    %cst_71 = arith.constant dense<0.000000e+00> : vector<8x128xf32>
    %132 = tpu.matmul %129, %130, %cst_71 {dimension_numbers = #tpu.dot_dimension_numbers<[1], [1], [0], [0], [0, 0, 1, 0], [], []>} : vector<8x16xbf16>, vector<128x16xbf16>, vector<8x128xf32> -> vector<8x128xf32>
    "tpu.trace_stop"() : () -> ()
    %133 = arith.addf %132, %92 : vector<8x128xf32>
    %cst_72 = arith.constant dense<0xFF800000> : vector<8xf32>
    %134 = vector.multi_reduction <maximumf>, %133, %cst_72 [1] : vector<8x128xf32> to vector<8xf32>
    %135 = vector.shape_cast %134 : vector<8xf32> to vector<8x1xf32>
    %136 = vector.broadcast %135 : vector<8x1xf32> to vector<8x128xf32>
    %137 = arith.subf %133, %136 : vector<8x128xf32>
    %138 = math.exp %137 : vector<8x128xf32>
    %cst_73 = arith.constant dense<0.000000e+00> : vector<8xf32>
    %139 = vector.multi_reduction <add>, %138, %cst_73 [1] : vector<8x128xf32> to vector<8xf32>
    %140 = vector.shape_cast %139 : vector<8xf32> to vector<8x1xf32>
    %141 = tpu.reciprocal %140 {approx = true} : vector<8x1xf32> -> vector<8x1xf32>
    %142 = vector.broadcast %141 : vector<8x1xf32> to vector<8x128xf32>
    %143 = arith.mulf %138, %142 : vector<8x128xf32>
    %c0_74 = arith.constant 0 : index
    %c1_75 = arith.constant 1 : index
    %c0_76 = arith.constant 0 : index
    %c0_77 = arith.constant 0 : index
    %144 = vector.load %arg25[%c0_74, %c1_75, %c0_76, %c0_77] : memref<1x2x8x128xf32, #tpu.memory_space<vmem>>, vector<1x1x8x128xf32>
    %145 = vector.shape_cast %144 : vector<1x1x8x128xf32> to vector<8x128xf32>
    %146 = vector.shape_cast %143 : vector<8x128xf32> to vector<1x1x8x128xf32>
    tpu.vector_store %arg25[%c0_74, %c1_75, %c0_76, %c0_77], %146 {strides = array<i32>} : memref<1x2x8x128xf32, #tpu.memory_space<vmem>>, vector<1x1x8x128xf32>,
    %147 = arith.truncf %143 : vector<8x128xf32> to vector<8x128xbf16>
    %cst_78 = arith.constant dense<0.000000e+00> : vector<8x16xf32>
    %148 = tpu.matmul %147, %131, %cst_78 {dimension_numbers = #tpu.dot_dimension_numbers<[1], [0], [0], [1], [0, 0, 1, 1], [], []>} : vector<8x128xbf16>, vector<128x16xbf16>, vector<8x16xf32> -> vector<8x16xf32>
    %149 = tpu.concatenate %128, %148 in 1 : vector<8x16xf32>, vector<8x16xf32> -> vector<8x32xf32>
    %150 = arith.truncf %149 : vector<8x32xf32> to vector<8x32xbf16>
    %cst_79 = arith.constant dense<0.000000e+00> : vector<8x32xf32>
    %151 = tpu.matmul %150, %96, %cst_79 {dimension_numbers = #tpu.dot_dimension_numbers<[1], [0], [0], [1], [0, 0, 1, 1], [], []>} : vector<8x32xbf16>, vector<32x32xbf16>, vector<8x32xf32> -> vector<8x32xf32>
    %152 = arith.addf %151, %89 : vector<8x32xf32>
    %cst_80 = arith.constant dense<0.000000e+00> : vector<8xf32>
    %153 = vector.multi_reduction <add>, %152, %cst_80 [1] : vector<8x32xf32> to vector<8xf32>
    %154 = vector.shape_cast %153 : vector<8xf32> to vector<8x1xf32>
    %cst_81 = arith.constant 3.200000e+01 : f32
    %155 = vector.broadcast %cst_81 : f32 to vector<8x1xf32>
    %156 = arith.divf %154, %155 : vector<8x1xf32>
    %157 = vector.broadcast %156 : vector<8x1xf32> to vector<8x32xf32>
    %158 = arith.subf %152, %157 : vector<8x32xf32>
    %159 = arith.mulf %158, %158 : vector<8x32xf32>
    %cst_82 = arith.constant dense<0.000000e+00> : vector<8xf32>
    %160 = vector.multi_reduction <add>, %159, %cst_82 [1] : vector<8x32xf32> to vector<8xf32>
    %161 = vector.shape_cast %160 : vector<8xf32> to vector<8x1xf32>
    %cst_83 = arith.constant 3.200000e+01 : f32
    %162 = vector.broadcast %cst_83 : f32 to vector<8x1xf32>
    %163 = arith.divf %161, %162 : vector<8x1xf32>
    %164 = vector.broadcast %156 : vector<8x1xf32> to vector<8x32xf32>
    %165 = arith.subf %152, %164 : vector<8x32xf32>
    %cst_84 = arith.constant 9.99999997E-7 : f32
    %166 = vector.broadcast %cst_84 : f32 to vector<8x1xf32>
    %167 = arith.addf %163, %166 : vector<8x1xf32>
    %168 = math.rsqrt %167 : vector<8x1xf32>
    %169 = vector.broadcast %168 : vector<8x1xf32> to vector<8x32xf32>
    %170 = arith.mulf %165, %169 : vector<8x32xf32>
    %171 = vector.broadcast %97 : vector<1x32xf32> to vector<8x32xf32>
    %172 = arith.mulf %170, %171 : vector<8x32xf32>
    %173 = vector.broadcast %98 : vector<1x32xf32> to vector<8x32xf32>
    %174 = arith.addf %172, %173 : vector<8x32xf32>
    %175 = arith.truncf %174 : vector<8x32xf32> to vector<8x32xbf16>
    %c0_85 = arith.constant 0 : index
    %c0_86 = arith.constant 0 : index
    %176 = vector.load %arg17[%c0_85, %c0_86] : memref<32x64xbf16, #tpu.memory_space<vmem>>, vector<32x64xbf16>
    %cst_87 = arith.constant dense<0.000000e+00> : vector<8x64xf32>
    %177 = tpu.matmul %175, %176, %cst_87 {dimension_numbers = #tpu.dot_dimension_numbers<[1], [0], [0], [1], [0, 0, 1, 1], [], []>} : vector<8x32xbf16>, vector<32x64xbf16>, vector<8x64xf32> -> vector<8x64xf32>
    %c0_88 = arith.constant 0 : index
    %c0_89 = arith.constant 0 : index
    %178 = vector.load %arg18[%c0_88, %c0_89] : memref<1x64xf32, #tpu.memory_space<vmem>>, vector<1x64xf32>
    %179 = vector.broadcast %178 : vector<1x64xf32> to vector<8x64xf32>
    %180 = arith.addf %177, %179 : vector<8x64xf32>
    %cst_90 = arith.constant 0.000000e+00 : f32
    %181 = vector.broadcast %cst_90 : f32 to vector<8x64xf32>
    %182 = arith.maximumf %180, %181 : vector<8x64xf32>
    %183 = arith.truncf %182 : vector<8x64xf32> to vector<8x64xbf16>
    %c0_91 = arith.constant 0 : index
    %c0_92 = arith.constant 0 : index
    %184 = vector.load %arg19[%c0_91, %c0_92] : memref<64x32xbf16, #tpu.memory_space<vmem>>, vector<64x32xbf16>
    %cst_93 = arith.constant dense<0.000000e+00> : vector<8x32xf32>
    %185 = tpu.matmul %183, %184, %cst_93 {dimension_numbers = #tpu.dot_dimension_numbers<[1], [0], [0], [1], [0, 0, 1, 1], [], []>} : vector<8x64xbf16>, vector<64x32xbf16>, vector<8x32xf32> -> vector<8x32xf32>
    %c0_94 = arith.constant 0 : index
    %c0_95 = arith.constant 0 : index
    %186 = vector.load %arg20[%c0_94, %c0_95] : memref<1x32xf32, #tpu.memory_space<vmem>>, vector<1x32xf32>
    %187 = vector.broadcast %186 : vector<1x32xf32> to vector<8x32xf32>
    %188 = arith.addf %185, %187 : vector<8x32xf32>
    %189 = arith.addf %188, %174 : vector<8x32xf32>
    %c0_96 = arith.constant 0 : index
    %c0_97 = arith.constant 0 : index
    %190 = vector.load %arg21[%c0_96, %c0_97] : memref<1x32xf32, #tpu.memory_space<vmem>>, vector<1x32xf32>
    %c0_98 = arith.constant 0 : index
    %c0_99 = arith.constant 0 : index
    %191 = vector.load %arg22[%c0_98, %c0_99] : memref<1x32xf32, #tpu.memory_space<vmem>>, vector<1x32xf32>
    %cst_100 = arith.constant dense<0.000000e+00> : vector<8xf32>
    %192 = vector.multi_reduction <add>, %189, %cst_100 [1] : vector<8x32xf32> to vector<8xf32>
    %193 = vector.shape_cast %192 : vector<8xf32> to vector<8x1xf32>
    %cst_101 = arith.constant 3.200000e+01 : f32
    %194 = vector.broadcast %cst_101 : f32 to vector<8x1xf32>
    %195 = arith.divf %193, %194 : vector<8x1xf32>
    %196 = vector.broadcast %195 : vector<8x1xf32> to vector<8x32xf32>
    %197 = arith.subf %189, %196 : vector<8x32xf32>
    %198 = arith.mulf %197, %197 : vector<8x32xf32>
    %cst_102 = arith.constant dense<0.000000e+00> : vector<8xf32>
    %199 = vector.multi_reduction <add>, %198, %cst_102 [1] : vector<8x32xf32> to vector<8xf32>
    %200 = vector.shape_cast %199 : vector<8xf32> to vector<8x1xf32>
    %cst_103 = arith.constant 3.200000e+01 : f32
    %201 = vector.broadcast %cst_103 : f32 to vector<8x1xf32>
    %202 = arith.divf %200, %201 : vector<8x1xf32>
    %203 = vector.broadcast %195 : vector<8x1xf32> to vector<8x32xf32>
    %204 = arith.subf %189, %203 : vector<8x32xf32>
    %cst_104 = arith.constant 9.99999997E-7 : f32
    %205 = vector.broadcast %cst_104 : f32 to vector<8x1xf32>
    %206 = arith.addf %202, %205 : vector<8x1xf32>
    %207 = math.rsqrt %206 : vector<8x1xf32>
    %208 = vector.broadcast %207 : vector<8x1xf32> to vector<8x32xf32>
    %209 = arith.mulf %204, %208 : vector<8x32xf32>
    %210 = vector.broadcast %190 : vector<1x32xf32> to vector<8x32xf32>
    %211 = arith.mulf %209, %210 : vector<8x32xf32>
    %212 = vector.broadcast %191 : vector<1x32xf32> to vector<8x32xf32>
    %213 = arith.addf %211, %212 : vector<8x32xf32>
    %c0_105 = arith.constant 0 : index
    %c0_106 = arith.constant 0 : index
    %c0_107 = arith.constant 0 : index
    %214 = vector.load %arg23[%c0_105, %c0_106, %c0_107] : memref<1x8x32xf32, #tpu.memory_space<vmem>>, vector<1x8x32xf32>
    %215 = vector.shape_cast %214 : vector<1x8x32xf32> to vector<8x32xf32>
    %216 = vector.shape_cast %213 : vector<8x32xf32> to vector<1x8x32xf32>
    tpu.vector_store %arg23[%c0_105, %c0_106, %c0_107], %216 {strides = array<i32>} : memref<1x8x32xf32, #tpu.memory_space<vmem>>, vector<1x8x32xf32>,
    return
  }
  func.func @transform_0(%arg0: i32) -> (i32, i32, i32) {
    %c0_i32 = arith.constant 0 : i32
    %c0_i32_0 = arith.constant 0 : i32
    %c0_i32_1 = arith.constant 0 : i32
    return %arg0, %c0_i32, %c0_i32_0 : i32, i32, i32
  }
  func.func @transform_1(%arg0: i32) -> (i32, i32, i32) {
    %c0_i32 = arith.constant 0 : i32
    %c0_i32_0 = arith.constant 0 : i32
    %c0_i32_1 = arith.constant 0 : i32
    return %arg0, %c0_i32, %c0_i32_0 : i32, i32, i32
  }
  func.func @transform_2(%arg0: i32) -> (i32, i32, i32) {
    %c0_i32 = arith.constant 0 : i32
    %c0_i32_0 = arith.constant 0 : i32
    %c0_i32_1 = arith.constant 0 : i32
    return %arg0, %c0_i32, %c0_i32_0 : i32, i32, i32
  }
  func.func @transform_3(%arg0: i32) -> (i32, i32, i32) {
    %c0_i32 = arith.constant 0 : i32
    %c0_i32_0 = arith.constant 0 : i32
    %c0_i32_1 = arith.constant 0 : i32
    return %arg0, %c0_i32, %c0_i32_0 : i32, i32, i32
  }
  func.func @transform_4(%arg0: i32) -> (i32, i32) {
    %c0_i32 = arith.constant 0 : i32
    %c0_i32_0 = arith.constant 0 : i32
    %c0_i32_1 = arith.constant 0 : i32
    return %c0_i32, %c0_i32_0 : i32, i32
  }
  func.func @transform_5(%arg0: i32) -> (i32, i32) {
    %c0_i32 = arith.constant 0 : i32
    %c0_i32_0 = arith.constant 0 : i32
    %c0_i32_1 = arith.constant 0 : i32
    return %c0_i32, %c0_i32_0 : i32, i32
  }
  func.func @transform_6(%arg0: i32) -> (i32, i32) {
    %c0_i32 = arith.constant 0 : i32
    %c0_i32_0 = arith.constant 0 : i32
    %c0_i32_1 = arith.constant 0 : i32
    return %c0_i32, %c0_i32_0 : i32, i32
  }
  func.func @transform_7(%arg0: i32) -> (i32, i32) {
    %c0_i32 = arith.constant 0 : i32
    %c0_i32_0 = arith.constant 0 : i32
    %c0_i32_1 = arith.constant 0 : i32
    return %c0_i32, %c0_i32_0 : i32, i32
  }
  func.func @transform_8(%arg0: i32) -> (i32, i32) {
    %c0_i32 = arith.constant 0 : i32
    %c0_i32_0 = arith.constant 0 : i32
    %c0_i32_1 = arith.constant 0 : i32
    return %c0_i32, %c0_i32_0 : i32, i32
  }
  func.func @transform_9(%arg0: i32) -> (i32, i32) {
    %c0_i32 = arith.constant 0 : i32
    %c0_i32_0 = arith.constant 0 : i32
    %c0_i32_1 = arith.constant 0 : i32
    return %c0_i32, %c0_i32_0 : i32, i32
  }
  func.func @transform_10(%arg0: i32) -> (i32, i32) {
    %c0_i32 = arith.constant 0 : i32
    %c0_i32_0 = arith.constant 0 : i32
    %c0_i32_1 = arith.constant 0 : i32
    return %c0_i32, %c0_i32_0 : i32, i32
  }
  func.func @transform_11(%arg0: i32) -> (i32, i32) {
    %c0_i32 = arith.constant 0 : i32
    %c0_i32_0 = arith.constant 0 : i32
    %c0_i32_1 = arith.constant 0 : i32
    return %c0_i32, %c0_i32_0 : i32, i32
  }
  func.func @transform_12(%arg0: i32) -> (i32, i32) {
    %c0_i32 = arith.constant 0 : i32
    %c0_i32_0 = arith.constant 0 : i32
    %c0_i32_1 = arith.constant 0 : i32
    return %c0_i32, %c0_i32_0 : i32, i32
  }
  func.func @transform_13(%arg0: i32) -> (i32, i32) {
    %c0_i32 = arith.constant 0 : i32
    %c0_i32_0 = arith.constant 0 : i32
    %c0_i32_1 = arith.constant 0 : i32
    return %c0_i32, %c0_i32_0 : i32, i32
  }
  func.func @transform_14(%arg0: i32) -> (i32, i32) {
    %c0_i32 = arith.constant 0 : i32
    %c0_i32_0 = arith.constant 0 : i32
    %c0_i32_1 = arith.constant 0 : i32
    return %c0_i32, %c0_i32_0 : i32, i32
  }
  func.func @transform_15(%arg0: i32) -> (i32, i32) {
    %c0_i32 = arith.constant 0 : i32
    %c0_i32_0 = arith.constant 0 : i32
    %c0_i32_1 = arith.constant 0 : i32
    return %c0_i32, %c0_i32_0 : i32, i32
  }
  func.func @transform_16(%arg0: i32) -> (i32, i32) {
    %c0_i32 = arith.constant 0 : i32
    %c0_i32_0 = arith.constant 0 : i32
    %c0_i32_1 = arith.constant 0 : i32
    return %c0_i32, %c0_i32_0 : i32, i32
  }
  func.func @transform_17(%arg0: i32) -> (i32, i32) {
    %c0_i32 = arith.constant 0 : i32
    %c0_i32_0 = arith.constant 0 : i32
    %c0_i32_1 = arith.constant 0 : i32
    return %c0_i32, %c0_i32_0 : i32, i32
  }
  func.func @transform_18(%arg0: i32) -> (i32, i32) {
    %c0_i32 = arith.constant 0 : i32
    %c0_i32_0 = arith.constant 0 : i32
    %c0_i32_1 = arith.constant 0 : i32
    return %c0_i32, %c0_i32_0 : i32, i32
  }
  func.func @transform_19(%arg0: i32) -> (i32, i32) {
    %c0_i32 = arith.constant 0 : i32
    %c0_i32_0 = arith.constant 0 : i32
    %c0_i32_1 = arith.constant 0 : i32
    return %c0_i32, %c0_i32_0 : i32, i32
  }
  func.func @transform_20(%arg0: i32) -> (i32, i32) {
    %c0_i32 = arith.constant 0 : i32
    %c0_i32_0 = arith.constant 0 : i32
    %c0_i32_1 = arith.constant 0 : i32
    return %c0_i32, %c0_i32_0 : i32, i32
  }
  func.func @transform_21(%arg0: i32) -> (i32, i32) {
    %c0_i32 = arith.constant 0 : i32
    %c0_i32_0 = arith.constant 0 : i32
    %c0_i32_1 = arith.constant 0 : i32
    return %c0_i32, %c0_i32_0 : i32, i32
  }
  func.func @transform_22(%arg0: i32) -> (i32, i32, i32) {
    %c0_i32 = arith.constant 0 : i32
    %c0_i32_0 = arith.constant 0 : i32
    %c0_i32_1 = arith.constant 0 : i32
    return %arg0, %c0_i32, %c0_i32_0 : i32, i32, i32
  }
  func.func @transform_23(%arg0: i32) -> (i32, i32, i32, i32) {
    %c0_i32 = arith.constant 0 : i32
    %c0_i32_0 = arith.constant 0 : i32
    %c0_i32_1 = arith.constant 0 : i32
    %c0_i32_2 = arith.constant 0 : i32
    return %arg0, %c0_i32, %c0_i32_0, %c0_i32_1 : i32, i32, i32, i32
  }
  func.func @transform_24(%arg0: i32) -> (i32, i32, i32, i32) {
    %c0_i32 = arith.constant 0 : i32
    %c0_i32_0 = arith.constant 0 : i32
    %c0_i32_1 = arith.constant 0 : i32
    %c0_i32_2 = arith.constant 0 : i32
    return %arg0, %c0_i32, %c0_i32_0, %c0_i32_1 : i32, i32, i32, i32
  }
}

</mosaic_0001>

<bundles_post_ra>
// kernel: tpu_custom_call.1
= control target key start
LH: loop header
LB: loop body
LE: loop exit
PB: predicated region body
PF: predicated region fallthrough
CT: control target
= control target key end

     0   :  { %s3359_s0 = inlined_call_operand.vmem [shape: f32[2,128,32], index: 0, kind: input, shape index: {}]   ;;  %s3360_s1 = inlined_call_operand.vmem [shape: f32[2,128,32], index: 1, kind: input, shape index: {}]   ;;  %s3361_s2 = inlined_call_operand.vmem [shape: bf16[2,8,128], index: 2, kind: input, shape index: {}]   ;;  %s3362_s3 = inlined_call_operand.vmem [shape: bf16[2,8,128], index: 3, kind: input, shape index: {}]   ;;  %s3363_s4 = inlined_call_operand.vmem [shape: bf16[32,32], index: 4, kind: input, shape index: {}]   ;;  %s3364_s5 = inlined_call_operand.vmem [shape: bf16[32,32], index: 5, kind: input, shape index: {}]   ;;  %s3365_s6 = inlined_call_operand.vmem [shape: bf16[32,32], index: 6, kind: input, shape index: {}]   ;;  %s3366_s7 = inlined_call_operand.vmem [shape: bf16[32,32], index: 7, kind: input, shape index: {}]   ;;  %s3367_s8 = inlined_call_operand.vmem [shape: f32[1,32], index: 8, kind: input, shape index: {}]   ;;  %s3368_s9 = inlined_call_operand.vmem [shape: f32[1,32], index: 9, kind: input, shape index: {}]   ;;  %s3369_s10 = inlined_call_operand.vmem [shape: bf16[32,32], index: 10, kind: input, shape index: {}]   ;;  %s3370_s11 = inlined_call_operand.vmem [shape: bf16[32,32], index: 11, kind: input, shape index: {}]   ;;  %s3371_s12 = inlined_call_operand.vmem [shape: bf16[32,32], index: 12, kind: input, shape index: {}]   ;;  %s3372_s13 = inlined_call_operand.vmem [shape: bf16[32,32], index: 13, kind: input, shape index: {}]   ;;  %s3373_s14 = inlined_call_operand.vmem [shape: f32[1,32], index: 14, kind: input, shape index: {}]   ;;  %s3374_s15 = inlined_call_operand.vmem [shape: f32[1,32], index: 15, kind: input, shape index: {}]   ;;  %s3375_s16 = inlined_call_operand.vmem [shape: bf16[32,64], index: 16, kind: input, shape index: {}]   ;;  %s3376_s17 = inlined_call_operand.vmem [shape: f32[1,64], index: 17, kind: input, shape index: {}]   ;;  %s3377_s18 = inlined_call_operand.vmem [shape: bf16[64,32], index: 18, kind: input, shape index: {}]   ;;  %s3378_s19 = inlined_call_operand.vmem [shape: f32[1,32], index: 19, kind: input, shape index: {}]   ;;  %s3379_s20 = inlined_call_operand.vmem [shape: f32[1,32], index: 20, kind: input, shape index: {}]   ;;  %s3380_s21 = inlined_call_operand.vmem [shape: f32[1,32], index: 21, kind: input, shape index: {}]   ;;  %s3381_s22 = inlined_call_operand.hbm [shape: f32[2,8,32], index: 22, kind: output, shape index: {0}]   ;;  %s3382_s23 = inlined_call_operand.hbm [shape: f32[2,2,8,128], index: 23, kind: output, shape index: {1}]   ;;  %s3383_s24 = inlined_call_operand.hbm [shape: f32[2,2,8,128], index: 24, kind: output, shape index: {2}]  }
   0x1   :  { %3407 = sst [smem:[#allocation16_spill]] %s3359_s0 }
   0x2   :  { %3408 = sst [smem:[#allocation17_spill]] %s3360_s1 }
   0x3   :  { %3409 = sst [smem:[#allocation18_spill]] %s3361_s2 }
   0x4   :  { %3410 = sst [smem:[#allocation19_spill]] %s3362_s3 }
   0x5   :  { %3411 = sst [smem:[#allocation20_spill]] %s3363_s4 }
   0x6   :  { %3412 = sst [smem:[#allocation21_spill]] %s3364_s5 }
   0x7   :  { %3413 = sst [smem:[#allocation22_spill]] %s3365_s6 }
   0x8   :  { %3414 = sst [smem:[#allocation23_spill]] %s3366_s7 }
   0x9   :  { %3415 = sst [smem:[#allocation24_spill]] %s3367_s8 }
   0xa   :  { %3416 = sst [smem:[#allocation25_spill]] %s3368_s9 }
   0xb   :  { %3417 = sst [smem:[#allocation26_spill]] %s3369_s10 }
   0xc   :  { %3418 = sst [smem:[#allocation27_spill]] %s3370_s11 }
   0xd   :  { %3419 = sst [smem:[#allocation28_spill]] %s3380_s21 }
   0xe   :  { %3420 = sst [smem:[#allocation29_spill]] %s3381_s22 }
   0xf   :  { %30 = vsyncpa [#allocation3], 0 }
  0x10   :  { %32 = vsyncpa [#allocation3 + $0x1], 0 }
  0x11   :  { %33 = vsyncpa [#allocation5], 0 }
  0x12   :  { %35 = vsyncpa [#allocation5 + $0x1], 0  ;;  %s2841_s5 = smov 0   ;;  %s2843_s26 = smov 0  }
  0x13   :  { %s2845_s27 = smov 0   ;;  %s2847_s28 = smov 0  }
  0x14 LB: > { %3421 = sst [smem:[#allocation9_spill]] %s2697_s5  ;;  %s2862_s6 = sadd.s32 4294967295, %s2709_s28   ;;  %s2709_s28 = sphi %s2847_s28, %s3453_s28   ;;  %s2705_s27 = sphi %s2845_s27, %s3456_s27   ;;  %s2701_s26 = sphi %s2843_s26, %s3455_s26   ;;  %s2697_s5 = sphi %s2841_s5, %s3454_s5  }
  0x15   : > { %3422 = sst [smem:[#allocation10_spill]] %s2701_s26  ;;  %s3388_s2 = sadd.s32 4294967294, %s2709_s28  }
  0x16   : > { %3423 = sst [smem:[#allocation11_spill]] %s2705_s27  ;;  %s2866_s29 = sadd.s32 1, %s2709_s28  }
  0x17   : > { %3424 = sst [smem:[#allocation12_spill]] %s2709_s28  ;;  %s530_s0 = sadd.s32 1, %s2705_s27 }
  0x18   : > { %3425 = sst [smem:[#allocation13_spill]] %s2866_s29  ;;  %s527_s7 = ssub.s32 %s2709_s28, %s2866_s29 }
  0x19   : > { %p540_p0 = scmp.ne.s32.totalorder %s2705_s27, %s2701_s26  ;;  %p528_p1 = scmp.eq.s32.totalorder %s527_s7, 0 }
  0x1a   : > { %p541_p2 = scmp.eq.s32.totalorder %s2862_s6, 1  ;;  %p546_p3 = scmp.ne.s32.totalorder %s2701_s26, %s2697_s5 }
  0x1b   : > { %p547_p4 = scmp.eq.s32.totalorder %s3388_s2, 1  ;;  %p2323_p7 = scmp.ge.s32.totalorder %s2709_s28, 1 }
  0x1c   : > { %s2879_s30 = scalar_select %p528_p1, %s2705_s27, %s530_s0  }
  0x1d   : > { %p2881_p5 = por %p541_p2, %p540_p0  ;;  %p2885_p6 = por %p547_p4, %p546_p3 }
  0x1e   : > { %3426 = sst [smem:[#allocation14_spill]] %s2879_s30  ;;  %p701_p8 = scmp.lt.s32.totalorder %s2709_s28, 3 }
  0x1f   : > { %s3428_s25 = scalar_select %p2885_p6, 1, 0 }
  0x20   : > { %p702_p9 = pnand %p2323_p7, %p701_p8 }
  0x21   : > { %3429 = sst [smem:[#allocation15_spill]] %s3428_s25  ;;  %p790_p10 = scmp.lt.s32.totalorder (!%p702_p9), %s2862_s6, 1 }
  0x22   : > { %705 = sbr.rel (%p702_p9) target bundleno = 3309 (0xced), region = 108  ;;  %s3430_s1 = sld [smem:[#allocation21_spill]] (!%p702_p9) }
  0x23   : > { %s3431_s25 = sld [smem:[#allocation16_spill]] (!%p702_p9)  ;;  %s3395_s8 = smov (!%p702_p9), 112  }
  0x24   : > { %s3433_s7 = sld [smem:[#allocation20_spill]] (!%p702_p9) }
  0x25   : > { %s3434_s27 = sld [smem:[#allocation18_spill]] (!%p702_p9) }
  0x26   : > { %s3437_s28 = sld [smem:[#allocation17_spill]] (!%p702_p9) }
  0x27   : > { %s2899_s2 = scalar_select %p790_p10, %s2862_s6, 1  ;;  %vm882_vm0 = vcmask 261120   ;;  %vm1119_vm1 = vcmask 130048   ;;  %vm2051_vm9 = vcmask 523264  }
  0x28   : > { %v2480_v0 = vld [vmem:[%s3430_s1 + $0x8] sm:$0xff]  ;;  %v2479_v1 = vld [vmem:[%s3430_s1] sm:$0xff]  ;;  %s2712_s1 = smov 16   ;;  %s3438_s11 = sld [smem:[#allocation27_spill]] }
  0x29   : > { %942 = vmatpush.bf16.msra.mxu1 %v2480_v0  ;;  %s3398_s30 = sshll.u32 %s2899_s2, 7  ;;  %s3394_s4 = sshll.u32 %s2899_s2, 2 }
  0x2a   : > { %s2907_s5 = scalar_lea.vmem %s3431_s25, %s3398_s30  ;;  %s3432_s25 = sld [smem:[#allocation22_spill]]  ;;  %v2478_v36 = vld [vmem:[%s3433_s7 + $0x8] sm:$0xff]  ;;  %v2477_v39 = vld [vmem:[%s3433_s7] sm:$0xff] }
  0x2b   : > { %v2910_v2 = vld [vmem:[%s2907_s5] sm:$0xff]  ;;  %v810_v3 = vld [vmem:[%s2907_s5 + $0x8] sm:$0xff]  ;;  %v811_v5 = vld [vmem:[%s2907_s5 + $0x10] sm:$0xff]  ;;  %892 = vmatpush.bf16.msra.mxu0 %v2478_v36  ;;  %s803_s29 = scalar_lea.vmem %s3434_s27, %s3394_s4  ;;  %s3436_s7 = sshll.u32 %s2899_s2, 7 }
  0x2c   : > { %v862_v4 = vpack.c.bf16 %v810_v3, %v2910_v2  ;;  %v812_v6 = vld [vmem:[%s2907_s5 + $0x18] sm:$0xff]  ;;  %v813_v8 = vld [vmem:[%s2907_s5 + $0x20] sm:$0xff]  ;;  %v814_v9 = vld [vmem:[%s2907_s5 + $0x28] sm:$0xff]  ;;  %v861_v43 = vpack.c.bf16 %v2910_v2, %v2910_v2  ;;  %s3054_s21 = scalar_lea.vmem %s3437_s28, %s3436_s7  ;;  %s3440_s10 = sld [smem:[#allocation26_spill]] }
  0x2d   : > { %943 = vmatpush.bf16.msra.mxu1 %v2479_v1  ;;  %v863_v7 = vpack.c.bf16 %v812_v6, %v811_v5  ;;  %v864_v10 = vpack.c.bf16 %v814_v9, %v813_v8  ;;  %v815_v11 = vld [vmem:[%s2907_s5 + $0x30] sm:$0xff]  ;;  %v816_v12 = vld [vmem:[%s2907_s5 + $0x38] sm:$0xff]  ;;  %v817_v14 = vld [vmem:[%s2907_s5 + $0x40] sm:$0xff]  ;;  %s3442_s9 = sld [smem:[#allocation25_spill]]  ;;  %s3443_s7 = sshll.u32 %s2899_s2, 2 }
  0x2e   : > { %v865_v13 = vpack.c.bf16 %v816_v12, %v815_v11  ;;  %v818_v15 = vld [vmem:[%s2907_s5 + $0x48] sm:$0xff]  ;;  %v819_v17 = vld [vmem:[%s2907_s5 + $0x50] sm:$0xff]  ;;  %v820_v18 = vld [vmem:[%s2907_s5 + $0x58] sm:$0xff]  ;;  %s3444_s30 = sld [smem:[#allocation19_spill]]  ;;  %s2107_s28 = sand.u32 1, %s2862_s6  }
  0x2f   : > { %v866_v16 = vpack.c.bf16 %v818_v15, %v817_v14  ;;  %v867_v19 = vpack.c.bf16 %v820_v18, %v819_v17  ;;  %v821_v20 = vld [vmem:[%s2907_s5 + $0x60] sm:$0xff]  ;;  %v822_v21 = vld [vmem:[%s2907_s5 + $0x68] sm:$0xff]  ;;  %v823_v23 = vld [vmem:[%s2907_s5 + $0x70] sm:$0xff]  ;;  %893 = vmatpush.bf16.msra.mxu0 %v2477_v39 }
  0x30   : > { %2350 = vmatmul.msk.bf16.vlgmr.msra.gmra.mxu1 %vm882_vm0, %v862_v4  ;;  %v868_v22 = vpack.c.bf16 %v822_v21, %v821_v20  ;;  %v824_v24 = vld [vmem:[%s2907_s5 + $0x78] sm:$0xff]  ;;  %v2482_v26 = vld [vmem:[%s3432_s25 + $0x8] sm:$0xff]  ;;  %v2481_v27 = vld [vmem:[%s3432_s25] sm:$0xff]  ;;  %s3033_s5 = sand.u32 1, %s2701_s26   ;;  %s3441_s26 = sld [smem:[#allocation24_spill]] }
  0x31   : > { %v2935_v25 = vpack.c.bf16 %v824_v24, %v823_v23  ;;  %1003 = vmatpush.bf16.msra.mxu2 %v2482_v26  ;;  %s3397_s0 = sshll.u32 %s3033_s5, 4  ;;  %s3445_s2 = sshll.u32 %s3033_s5, 4 }
  0x32   : > { %2341 = vmatmul.msk.bf16.vlgmr.msra.gmra.mxu0 %vm882_vm0, %v861_v43  ;;  %s3038_s27 = scalar_lea.vmem [#allocation4], %s3397_s0  ;;  %s3225_s22 = scalar_lea.vmem [#allocation6], %s3445_s2 }
  0x33   : > { %s2499_s25 = sshll.u32 %s2862_s6, 4  ;;  %s2139_s4 = sshll.u32 %s3038_s27, 4  ;;  %s2140_s4 = int_to_ptr.vmem [resolvable:$true] %s2139_s4 }
  0x34   : > { %s807_s0 = scalar_lea.vmem %s3444_s30, %s3443_s7 }
  0x35   : > { %1004 = vmatpush.bf16.msra.mxu2 %v2481_v27 }
  0x38   : > { %2366 = vmatmul.msk.bf16.vlgmr.msra.gmra.mxu2 %vm882_vm0, %v862_v4 }
  0x40   : > { %2351 = vmatmul.msk.bf16.gmra.mxu1 %vm882_vm0, %v863_v7 }
  0x48   : > { %2367 = vmatmul.msk.bf16.gmra.mxu2 %vm882_vm0, %v863_v7 }
  0x50   : > { %2352 = vmatmul.msk.bf16.gmra.mxu1 %vm882_vm0, %v864_v10 }
  0x58   : > { %2368 = vmatmul.msk.bf16.gmra.mxu2 %vm882_vm0, %v864_v10 }
  0x60   : > { %2353 = vmatmul.msk.bf16.gmra.mxu1 %vm882_vm0, %v865_v13 }
  0x68   : > { %2369 = vmatmul.msk.bf16.gmra.mxu2 %vm882_vm0, %v865_v13 }
  0x70   : > { %2354 = vmatmul.msk.bf16.gmra.mxu1 %vm882_vm0, %v866_v16 }
  0x78   : > { %2370 = vmatmul.msk.bf16.gmra.mxu2 %vm882_vm0, %v866_v16 }
  0x80   : > { %2355 = vmatmul.msk.bf16.gmra.mxu1 %vm882_vm0, %v867_v19 }
  0x88   : > { %2371 = vmatmul.msk.bf16.gmra.mxu2 %vm882_vm0, %v867_v19 }
  0x90   : > { %2356 = vmatmul.msk.bf16.gmra.mxu1 %vm882_vm0, %v868_v22 }
  0x98   : > { %2372 = vmatmul.msk.bf16.gmra.mxu2 %vm882_vm0, %v868_v22 }
  0xa0   : > { %2357 = vmatmul.msk.bf16.gmra.mxu1 %vm882_vm0, %v2935_v25 }
  0xa8   : > { %2373 = vmatmul.msk.bf16.gmra.mxu2 %vm882_vm0, %v2935_v25 }
  0xad   : > { %v945_v28 = vpop.f32.mrf.mxu1 }
  0xae   : > { %v1047_v29 = vpack.c.bf16 %v945_v28, %v945_v28 }
  0xb0   : > { %v1095_v32 = vunpack.c.l.b16 %v1047_v29 }
  0xb5   : > { %v947_v30 = vpop.f32.mrf.mxu1 }
  0xb6   : > { %v1048_v31 = vpack.c.bf16 %v947_v30, %v947_v30 }
  0xb8   : > { %v1096_v33 = vunpack.c.l.b16 %v1048_v31 }
  0xba   : > { %v2947_v34 = vpack.c.b16 %v1096_v33, %v1095_v32  ;;  %v895_v32 = vpop.f32.mrf.mxu0 }
  0xbb   : > { %v2973_v19 = vpop.f32.mrf.mxu2  ;;  %v899_v33 = vmul.f32 0.25, %v895_v32 }
  0xbd   : > { %v950_v35 = vpop.f32.mrf.mxu1  ;;  %v1046_v36 = vpack.c.bf16 %v899_v33, %v899_v33 }
  0xbe   : > { %v1049_v37 = vpack.c.bf16 %v950_v35, %v950_v35 }
  0xc0   : > { %v1097_v41 = vunpack.c.l.b16 %v1049_v37 }
  0xc3   : > { %v2977_v26 = vpop.f32.mrf.mxu2 }
  0xc5   : > { %v952_v38 = vpop.f32.mrf.mxu1 }
  0xc6   : > { %v1050_v40 = vpack.c.bf16 %v952_v38, %v952_v38  ;;  %v1233_v38 = vunpack.c.l.b16 %v1046_v36 }
  0xc8   : > { %v1098_v42 = vunpack.c.l.b16 %v1050_v40  ;;  %v1234_v39 = vpack.c.b16 %v1233_v38, %v1233_v38  ;;  %v897_v40 = vpop.f32.mrf.mxu0 }
  0xca   : > { %v2958_v44 = vpack.c.b16 %v1098_v42, %v1097_v41 }
  0xcb   : > { %v2981_v28 = vpop.f32.mrf.mxu2 }
  0xcd   : > { %v955_v45 = vpop.f32.mrf.mxu1 }
  0xce   : > { %v1051_v55 = vpack.c.bf16 %v955_v45, %v955_v45  ;;  %v1127_v45 = vsel %vm1119_vm1, %v2958_v44, 0 }
  0xd0   : > { %v1099_v58 = vunpack.c.l.b16 %v1051_v55 }
  0xd3   : > { %v2986_v30 = vpop.f32.mrf.mxu2 }
  0xd5   : > { %v957_v46 = vpop.f32.mrf.mxu1 }
  0xd6   : > { %v1052_v53 = vpack.c.bf16 %v957_v46, %v957_v46 }
  0xd8   : > { %v1100_v57 = vunpack.c.l.b16 %v1052_v53 }
  0xda   : > { %v1113_v59 = vpack.c.b16 %v1100_v57, %v1099_v58 }
  0xdb   : > { %v2989_v35 = vpop.f32.mrf.mxu2 }
  0xdc   : > { %v1130_v42 = vsel %vm1119_vm1, %v1113_v59, 0 }
  0xdd   : > { %v960_v47 = vpop.f32.mrf.mxu1 }
  0xde   : > { %v1053_v48 = vpack.c.bf16 %v960_v47, %v960_v47  ;;  %v1124_v47 = vsel %vm1119_vm1, %v2947_v34, 0 }
  0xe0   : > { %v1101_v51 = vunpack.c.l.b16 %v1053_v48 }
  0xe3   : > { %v1018_v41 = vpop.f32.mrf.mxu2 }
  0xe5   : > { %v962_v49 = vpop.f32.mrf.mxu1 }
  0xe6   : > { %v1054_v50 = vpack.c.bf16 %v962_v49, %v962_v49 }
  0xe8   : > { %v1102_v52 = vunpack.c.l.b16 %v1054_v50 }
  0xea   : > { %v1114_v54 = vpack.c.b16 %v1102_v52, %v1101_v51 }
  0xeb   : > { %v1021_v43 = vpop.f32.mrf.mxu2 }
  0xec   : > { %1243 = vrot.lane.b32.xlu2 %v1114_v54, %s3395_s8  ;;  %v1133_v37 = vsel %vm1119_vm1, %v1114_v54, 0 }
  0xed   : > { %v965_v56 = vpop.f32.mrf.mxu1 }
  0xee   : > { %v1055_v6 = vpack.c.bf16 %v965_v56, %v965_v56 }
  0xf0   : > { %v1103_v9 = vunpack.c.l.b16 %v1055_v6 }
  0xf3   : > { %v1023_v46 = vpop.f32.mrf.mxu2 }
  0xf4   : > { %1241 = vrot.lane.b32.xlu2 %v1113_v59, %s3395_s8 }
  0xf5   : > { %v967_v60 = vpop.f32.mrf.mxu1 }
  0xf6   : > { %v1056_v4 = vpack.c.bf16 %v967_v60, %v967_v60 }
  0xf8   : > { %v1104_v8 = vunpack.c.l.b16 %v1056_v4 }
  0xfa   : > { %v1115_v10 = vpack.c.b16 %v1104_v8, %v1103_v9 }
  0xfb   : > { %v1026_v48 = vpop.f32.mrf.mxu2 }
  0xfc   : > { %v1136_v31 = vsel %vm1119_vm1, %v1115_v10, 0  ;;  %1235 = vrot.lane.b32.xlu2 %v1234_v39, %s3395_s8 }
  0xfd   : > { %v970_v61 = vpop.f32.mrf.mxu1 }
  0xfe   : > { %v1057_v62 = vpack.c.bf16 %v970_v61, %v970_v61 }
 0x100   : > { %v1105_v1 = vunpack.c.l.b16 %v1057_v62 }
 0x103   : > { %v1028_v49 = vpop.f32.mrf.mxu2 }
 0x105   : > { %v972_v63 = vpop.f32.mrf.mxu1 }
 0x106   : > { %v1058_v0 = vpack.c.bf16 %v972_v63, %v972_v63 }
 0x108   : > { %v1106_v3 = vunpack.c.l.b16 %v1058_v0 }
 0x10a   : > { %v1116_v5 = vpack.c.b16 %v1106_v3, %v1105_v1 }
 0x10b   : > { %v1031_v50 = vpop.f32.mrf.mxu2 }
 0x10c   : > { %1247 = vrot.lane.b32.xlu1 %v1116_v5, %s3395_s8  ;;  %v1139_v29 = vsel %vm1119_vm1, %v1116_v5, 0 }
 0x10d   : > { %v975_v7 = vpop.f32.mrf.mxu1 }
 0x10e   : > { %v1059_v20 = vpack.c.bf16 %v975_v7, %v975_v7 }
 0x110   : > { %v1107_v24 = vunpack.c.l.b16 %v1059_v20  ;;  %v1073_v20 = vpack.c.bf16 %v1031_v50, %v1031_v50 }
 0x113   : > { %v1033_v51 = vpop.f32.mrf.mxu2 }
 0x114   : > { %1245 = vrot.lane.b32.xlu1 %v1115_v10, %s3395_s8 }
 0x115   : > { %v977_v11 = vpop.f32.mrf.mxu1 }
 0x116   : > { %v1060_v16 = vpack.c.bf16 %v977_v11, %v977_v11  ;;  %v1067_v11 = vpack.c.bf16 %v2989_v35, %v2989_v35 }
 0x118   : > { %v1108_v22 = vunpack.c.l.b16 %v1060_v16 }
 0x11a   : > { %v1117_v25 = vpack.c.b16 %v1108_v22, %v1107_v24  ;;  %v1066_v24 = vpack.c.bf16 %v2986_v30, %v2986_v30 }
 0x11b   : > { %v1036_v52 = vpop.f32.mrf.mxu2 }
 0x11c   : > { %1237 = vrot.lane.b32.xlu1 %v2947_v34, %s3395_s8  ;;  %v1142_v27 = vsel %vm1119_vm1, %v1117_v25, 0  ;;  %v1075_v8 = vpack.c.bf16 %v1036_v52, %v1036_v52  ;;  %v1190_v40 = vunpack.c.l.b16 %v1066_v24  ;;  %v2488_v24 = vld [vmem:[%s3438_s11 + $0x8] sm:$0xff] }
 0x11d   : > { %v980_v12 = vpop.f32.mrf.mxu1 }
 0x11e   : > { %v1061_v13 = vpack.c.bf16 %v980_v12, %v980_v12  ;;  %v1068_v12 = vpack.c.bf16 %v1018_v41, %v1018_v41  ;;  %v1199_v16 = vunpack.c.l.b16 %v1075_v8 }
 0x120   : > { %v1109_v17 = vunpack.c.l.b16 %v1061_v13  ;;  %v1069_v13 = vpack.c.bf16 %v1021_v43, %v1021_v43 }
 0x123   : > { %v1038_v53 = vpop.f32.mrf.mxu2 }
 0x124   : > { %v1076_v9 = vpack.c.bf16 %v1038_v53, %v1038_v53 }
 0x125   : > { %v982_v14 = vpop.f32.mrf.mxu1 }
 0x126   : > { %v1062_v15 = vpack.c.bf16 %v982_v14, %v982_v14  ;;  %v1070_v14 = vpack.c.bf16 %v1023_v46, %v1023_v46 }
 0x128   : > { %v1110_v18 = vunpack.c.l.b16 %v1062_v15  ;;  %v1071_v15 = vpack.c.bf16 %v1026_v48, %v1026_v48  ;;  %v1064_v48 = vpack.c.bf16 %v2977_v26, %v2977_v26 }
 0x12a   : > { %v1118_v21 = vpack.c.b16 %v1110_v18, %v1109_v17  ;;  %v1200_v17 = vunpack.c.l.b16 %v1076_v9  ;;  %v1072_v18 = vpack.c.bf16 %v1028_v49, %v1028_v49  ;;  %v1195_v33 = vunpack.c.l.b16 %v1071_v15 }
 0x12b   : > { %v1041_v54 = vpop.f32.mrf.mxu2  ;;  %v1188_v50 = vunpack.c.l.b16 %v1064_v48  ;;  %v836_v48 = vld [vmem:[%s3054_s21 + $0x58] sm:$0xff] }
 0x12c   : > { %1251 = vrot.lane.b32.xlu0 %v1118_v21, %s3395_s8  ;;  %v1145_v23 = vsel %vm1119_vm1, %v1118_v21, 0  ;;  %v1077_v56 = vpack.c.bf16 %v1041_v54, %v1041_v54  ;;  %v1074_v21 = vpack.c.bf16 %v1033_v51, %v1033_v51  ;;  %v1209_v32 = vpack.c.b16 %v1200_v17, %v1199_v16  ;;  %v841_v51 = vld [vmem:[%s803_s29] sm:$0xf]  ;;  %s2138_s29 = scalar_lea.hbm %s3382_s23, %s2499_s25 }
 0x12d   : > { %1147 = vmatpush.bf16.xpose.msra.mxu3 %v1145_v23  ;;  %v1065_v23 = vpack.c.bf16 %v2981_v28, %v2981_v28  ;;  %v842_v53 = vunpack.c.l.bf16 %v841_v51  ;;  %v838_v51 = vld [vmem:[%s3054_s21 + $0x68] sm:$0xff]  ;;  %s2141_s30 = sshll.u32 %s2138_s29, 4  ;;  %s2142_s30 = int_to_ptr.hbm [resolvable:$true] %s2141_s30 }
 0x12e   : > { %v1201_v58 = vunpack.c.l.b16 %v1077_v56  ;;  %v1198_v38 = vunpack.c.l.b16 %v1074_v21  ;;  %1317 = vrot.lane.b32.xlu2 %v1209_v32, %s3395_s8  ;;  %s2601_s2 = sshra.s32 %s2142_s30, 4  ;;  %s2602_s2 = int_to_ptr.hbm [resolvable:$true] %s2601_s2 }
 0x12f   : > { %v1189_v39 = vunpack.c.l.b16 %v1065_v23  ;;  %p2608_p0 = scmp.lt.s32.totalorder %s2602_s2, %s3382_s23 }
 0x134   : > { %1249 = vrot.lane.b32.xlu0 %v1117_v25, %s3395_s8  ;;  %v1191_v25 = vunpack.c.l.b16 %v1067_v11 }
 0x135   : > { %1148 = vmatpush.bf16.xpose.msra.mxu3 %v1142_v27  ;;  %v1192_v27 = vunpack.c.l.b16 %v1068_v12 }
 0x137   : > { %v1205_v43 = vpack.c.b16 %v1192_v27, %v1191_v25  ;;  %v2487_v25 = vld [vmem:[%s3438_s11] sm:$0xff] }
 0x138   : > { %v825_v27 = vld [vmem:[%s3054_s21] sm:$0xff] }
 0x13c   : > { %1239 = vrot.lane.b32.xlu0 %v2958_v44, %s3395_s8  ;;  %v1043_v44 = vpop.f32.mrf.mxu2 }
 0x13d   : > { %1149 = vmatpush.bf16.xpose.msra.mxu3 %v1139_v29  ;;  %v1078_v59 = vpack.c.bf16 %v1043_v44, %v1043_v44  ;;  %v1193_v29 = vunpack.c.l.b16 %v1069_v13 }
 0x13f   : > { %v1202_v60 = vunpack.c.l.b16 %v1078_v59 }
 0x141   : > { %v1210_v61 = vpack.c.b16 %v1202_v60, %v1201_v58 }
 0x143   : > { %1319 = vrot.lane.b32.xlu1 %v1210_v61, %s3395_s8  ;;  %1219 = vmatpush.bf16.msrb.mxu2 %v1210_v61 }
 0x145   : > { %1150 = vmatpush.bf16.xpose.msra.mxu3 %v1136_v31  ;;  %v1194_v31 = vunpack.c.l.b16 %v1070_v14 }
 0x146   : > { %v1244_v4 = vpop.permute.xlu2 %1243 }
 0x147   : > { %v1266_v5 = vsel %vm1119_vm1, %v1244_v4, 0  ;;  %1220 = vmatpush.bf16.msrb.mxu2 %v1209_v32  ;;  %v827_v32 = vld [vmem:[%s3054_s21 + $0x10] sm:$0xff] }
 0x14d   : > { %1151 = vmatpush.bf16.xpose.msra.mxu3 %v1133_v37  ;;  %v1197_v37 = vunpack.c.l.b16 %v1073_v20 }
 0x14e   : > { %v1242_v6 = vpop.permute.xlu2 %1241 }
 0x14f   : > { %v1263_v7 = vsel %vm1119_vm1, %v1242_v6, 0  ;;  %v1208_v30 = vpack.c.b16 %v1198_v38, %v1197_v37 }
 0x151   : > { %1221 = vmatpush.bf16.msrb.mxu2 %v1208_v30  ;;  %1315 = vrot.lane.b32.xlu2 %v1208_v30, %s3395_s8  ;;  %v831_v30 = vld [vmem:[%s3054_s21 + $0x30] sm:$0xff] }
 0x155   : > { %1152 = vmatpush.bf16.xpose.msra.mxu3 %v1130_v42  ;;  %v1206_v42 = vpack.c.b16 %v1194_v31, %v1193_v29  ;;  %v826_v29 = vld [vmem:[%s3054_s21 + $0x8] sm:$0xff] }
 0x156   : > { %v1236_v46 = vpop.permute.xlu2 %1235  ;;  %v3064_v31 = vpack.c.bf16 %v826_v29, %v825_v27 }
 0x15d   : > { %1153 = vmatpush.bf16.xpose.msra.mxu3 %v1127_v45  ;;  %v1204_v45 = vpack.c.b16 %v1190_v40, %v1189_v39  ;;  %v829_v39 = vld [vmem:[%s3054_s21 + $0x20] sm:$0xff]  ;;  %v830_v40 = vld [vmem:[%s3054_s21 + $0x28] sm:$0xff] }
 0x165   : > { %1154 = vmatpush.bf16.xpose.msra.mxu3 %v1124_v47  ;;  %v1063_v47 = vpack.c.bf16 %v2973_v19, %v2973_v19 }
 0x167   : > { %v1187_v49 = vunpack.c.l.b16 %v1063_v47  ;;  %v835_v47 = vld [vmem:[%s3054_s21 + $0x50] sm:$0xff] }
 0x169   : > { %v1203_v52 = vpack.c.b16 %v1188_v50, %v1187_v49  ;;  %v3096_v49 = vpack.c.bf16 %v836_v48, %v835_v47  ;;  %v837_v50 = vld [vmem:[%s3054_s21 + $0x60] sm:$0xff] }
 0x16c   : > { %2374 = vmatmul.msk.bf16.vlgmr.msra.gmra.mxu3 %vm1119_vm1, %v1046_v36  ;;  %v1196_v36 = vunpack.c.l.b16 %v1072_v18 }
 0x16e   : > { %v1207_v41 = vpack.c.b16 %v1196_v36, %v1195_v33  ;;  %v828_v33 = vld [vmem:[%s3054_s21 + $0x18] sm:$0xff] }
 0x170   : > { %1222 = vmatpush.bf16.msrb.mxu2 %v1207_v41  ;;  %1313 = vrot.lane.b32.xlu2 %v1207_v41, %s3395_s8  ;;  %v832_v41 = vld [vmem:[%s3054_s21 + $0x38] sm:$0xff] }
 0x174   : > { %1223 = vmatpush.bf16.msrb.mxu2 %v1206_v42 }
 0x178   : > { %1224 = vmatpush.bf16.msrb.mxu2 %v1205_v43  ;;  %1311 = vrot.lane.b32.xlu2 %v1206_v42, %s3395_s8  ;;  %v3084_v42 = vpack.c.bf16 %v832_v41, %v831_v30 }
 0x17c   : > { %1225 = vmatpush.bf16.msrb.mxu2 %v1204_v45 }
 0x17e   : > { %v1248_v63 = vpop.permute.xlu1 %1247 }
 0x17f   : > { %v1272_v0 = vsel %vm1119_vm1, %v1248_v63, 0 }
 0x180   : > { %1226 = vmatpush.bf16.msrb.mxu2 %v1203_v52 }
 0x186   : > { %v1246_v1 = vpop.permute.xlu1 %1245 }
 0x187   : > { %v1269_v3 = vsel %vm1119_vm1, %v1246_v1, 0 }
 0x188   : > { %v1318_v56 = vpop.permute.xlu2 %1317 }
 0x18e   : > { %v1238_v35 = vpop.permute.xlu1 %1237 }
 0x18f   : > { %v1257_v28 = vsel %vm1119_vm1, %v1238_v35, 0  ;;  %v3070_v35 = vpack.c.bf16 %v828_v33, %v827_v32 }
 0x19e   : > { %v1252_v55 = vpop.permute.xlu0 %1251 }
 0x19f   : > { %v1278_v57 = vsel %vm1119_vm1, %v1252_v55, 0 }
 0x1a0   : > { %1280 = vmatpush.bf16.xpose.msrb.mxu0 %v1278_v57 }
 0x1a6   : > { %v1250_v34 = vpop.permute.xlu0 %1249 }
 0x1a7   : > { %v1275_v62 = vsel %vm1119_vm1, %v1250_v34, 0 }
 0x1a8   : > { %1281 = vmatpush.bf16.xpose.msrb.mxu0 %v1275_v62 }
 0x1ab   : > { %v1316_v58 = vpop.permute.xlu2 %1315 }
 0x1ae   : > { %v1240_v10 = vpop.permute.xlu0 %1239 }
 0x1af   : > { %v1260_v22 = vsel %vm1119_vm1, %v1240_v10, 0 }
 0x1b0   : > { %1282 = vmatpush.bf16.xpose.msrb.mxu0 %v1272_v0 }
 0x1b5   : > { %v1320_v55 = vpop.permute.xlu1 %1319 }
 0x1b6   : > { %1329 = vmatpush.bf16.msrb.mxu3 %v1320_v55 }
 0x1b8   : > { %1283 = vmatpush.bf16.xpose.msrb.mxu0 %v1269_v3 }
 0x1ba   : > { %1330 = vmatpush.bf16.msrb.mxu3 %v1318_v56 }
 0x1be   : > { %1331 = vmatpush.bf16.msrb.mxu3 %v1316_v58 }
 0x1c0   : > { %1284 = vmatpush.bf16.xpose.msrb.mxu0 %v1266_v5 }
 0x1c8   : > { %1285 = vmatpush.bf16.xpose.msrb.mxu0 %v1263_v7 }
 0x1ca   : > { %v1314_v60 = vpop.permute.xlu2 %1313 }
 0x1cb   : > { %1332 = vmatpush.bf16.msrb.mxu3 %v1314_v60 }
 0x1d0   : > { %1286 = vmatpush.bf16.xpose.msrb.mxu0 %v1260_v22 }
 0x1d2   : > { %v1312_v34 = vpop.permute.xlu2 %1311 }
 0x1d3   : > { %1333 = vmatpush.bf16.msrb.mxu3 %v1312_v34 }
 0x1d8   : > { %1287 = vmatpush.bf16.xpose.msrb.mxu0 %v1257_v28  ;;  %v3078_v28 = vpack.c.bf16 %v830_v40, %v829_v39 }
 0x1df   : > { %2375 = vmatmul.msk.bf16.vlgmr.msrb.gmra.mxu0 %vm1119_vm1, %v1236_v46 }
 0x1ef   : > { %v1156_v19 = vpop.f32.mrf.mxu3 }
 0x1f0   : > { %v1157_v26 = vadd.f32 %v1156_v19, %v842_v53  ;;  %v840_v19 = vld [vmem:[%s3054_s21 + $0x78] sm:$0xff] }
 0x1f2   : > { %1160 = vmax.xlane.f32.xlu1 %v1157_v26 }
 0x1f7   : > { %v1158_v54 = vpop.f32.mrf.mxu3 }
 0x20b   : > { %1307 = vrot.lane.b32.xlu1 %v1204_v45, %s3395_s8  ;;  %v834_v45 = vld [vmem:[%s3054_s21 + $0x48] sm:$0xff] }
 0x25c   : > { %v1289_v57 = vpop.f32.mrf.mxu0 }
 0x25d   : > { %v1290_v44 = vadd.f32 %v1289_v57, %v842_v53  ;;  %v839_v53 = vld [vmem:[%s3054_s21 + $0x70] sm:$0xff] }
 0x25e   : > { %v3108_v54 = vpack.c.bf16 %v840_v19, %v839_v53 }
 0x25f   : > { %1293 = vmax.xlane.f32.xlu0 %v1290_v44 }
 0x264   : > { %v1291_v59 = vpop.f32.mrf.mxu0 }
 0x265   : > { %v1161_v61 = vpop.xlane.xlu1 %1160 }
 0x266   : > { %v1162_v62 = vsub.f32 %v1157_v26, %v1161_v61 }
 0x268   : > { %v1163_v63 = vmul.f32 1.442695, %v1162_v62 }
 0x26a   : > { %2563 = vpow2.f32 %v1163_v63 }
 0x270   : > { %v2564_v0 = vpop.eup %2563 }
 0x273   : > { %1309 = vrot.lane.b32.xlu0 %v1205_v43, %s3395_s8  ;;  %v833_v43 = vld [vmem:[%s3054_s21 + $0x40] sm:$0xff]  ;;  %s3439_s21 = smov 112  }
 0x274   : > { %v3090_v46 = vpack.c.bf16 %v834_v45, %v833_v43 }
 0x27b   : > { %1305 = vrot.lane.b32.xlu0 %v1203_v52, %s3395_s8  ;;  %s3435_s8 = sld [smem:[#allocation23_spill]]  ;;  %v3102_v52 = vpack.c.bf16 %v838_v51, %v837_v50 }
 0x27d   : > { %v1308_v7 = vpop.permute.xlu1 %1307 }
 0x281   : > { %v2484_v20 = vld [vmem:[%s3435_s8 + $0x8] sm:$0xff]  ;;  %v2483_v21 = vld [vmem:[%s3435_s8] sm:$0xff] }
 0x282   : > { %1369 = vmatpush.bf16.msra.mxu0 %v2484_v20 }
 0x286   : > { %1370 = vmatpush.bf16.msra.mxu0 %v2483_v21 }
 0x2a5   : > { %1165 = vadd.xlane.f32.xlu0 %v2564_v0 }
 0x2d2   : > { %v1294_v1 = vpop.xlane.xlu0 %1293 }
 0x2d3   : > { %v1295_v3 = vsub.f32 %v1290_v44, %v1294_v1 }
 0x2d5   : > { %v1296_v4 = vmul.f32 1.442695, %v1295_v3 }
 0x2d7   : > { %2565 = vpow2.f32 %v1296_v4 }
 0x2dd   : > { %v2566_v5 = vpop.eup %2565 }
 0x2de   : > { %1298 = vadd.xlane.f32.xlu2 %v2566_v5 }
 0x2e5   : > { %v1310_v6 = vpop.permute.xlu0 %1309 }
 0x2e6   : > { %1334 = vmatpush.bf16.msrb.mxu3 %v1310_v6 }
 0x2ea   : > { %1335 = vmatpush.bf16.msrb.mxu3 %v1308_v7 }
 0x2ed   : > { %v1306_v8 = vpop.permute.xlu0 %1305 }
 0x2ee   : > { %1336 = vmatpush.bf16.msrb.mxu3 %v1306_v8 }
 0x2f2   : > { %1513 = vmatpush.bf16.msra.mxu3 %v2488_v24  ;;  %v2713_v24 = vmov 32.0  }
 0x2f6   : > { %1514 = vmatpush.bf16.msra.mxu3 %v2487_v25 }
 0x318   : > { %v1166_v9 = vpop.xlane.xlu0 %1165 }
 0x319   : > { %2567 = vrcp.f32 %v1166_v9 }
 0x31f   : > { %v2568_v10 = vpop.eup %2567 }
 0x320   : > { %v1168_v11 = vmul.f32 %v2568_v10, %v2564_v0 }
 0x322   : > { %1169 = vst [vmem:[%s3038_s27] sm:$0xff] %v1168_v11  ;;  %v1170_v12 = vpack.c.bf16 %v1168_v11, %v1168_v11 }
 0x324   : > { %1227 = vmatmul.bf16.vlgmr.msrb.gmra.mxu2 %v1170_v12 }
 0x351   : > { %v1299_v13 = vpop.xlane.xlu2 %1298 }
 0x352   : > { %2569 = vrcp.f32 %v1299_v13 }
 0x353   : > { %2571 = vrcp.f32 %v2713_v24 }
 0x358   : > { %v2570_v14 = vpop.eup %2569 }
 0x359   : > { %v1301_v15 = vmul.f32 %v2570_v14, %v2566_v5  ;;  %v2572_v27 = vpop.eup %2571 }
 0x35a   : > { %v1380_v29 = vmul.f32 32.0, %v2572_v27  ;;  %vm1384_vm2 = vweird.f32 %v2572_v27 }
 0x35b   : > { %2376 = vst [vmem:[%s3038_s27 + $0x8] sm:$0xff] %v1301_v15  ;;  %v1304_v16 = vpack.c.bf16 %v1301_v15, %v1301_v15 }
 0x35c   : > { %v1381_v33 = vsub.f32 1.0, %v1380_v29 }
 0x35d   : > { %1337 = vmatmul.bf16.vlgmr.msrb.gmra.mxu3 %v1304_v16 }
 0x36d   : > { %2403 = vmatmul.msk.bf16.vlgmr.msra.gmra.mxu3 %vm882_vm0, %v3064_v31 }
 0x37d   : > { %2404 = vmatmul.msk.bf16.gmra.mxu3 %vm882_vm0, %v3070_v35 }
 0x38d   : > { %2405 = vmatmul.msk.bf16.gmra.mxu3 %vm882_vm0, %v3078_v28 }
 0x39d   : > { %2406 = vmatmul.msk.bf16.gmra.mxu3 %vm882_vm0, %v3084_v42 }
 0x3a7   : > { %v1228_v17 = vpop.f32.mrf.mxu2 }
 0x3ad   : > { %2407 = vmatmul.msk.bf16.gmra.mxu3 %vm882_vm0, %v3090_v46 }
 0x3af   : > { %v1230_v18 = vpop.f32.mrf.mxu2 }
 0x3bd   : > { %2408 = vmatmul.msk.bf16.gmra.mxu3 %vm882_vm0, %v3096_v49 }
 0x3cd   : > { %2409 = vmatmul.msk.bf16.gmra.mxu3 %vm882_vm0, %v3102_v52 }
 0x3dd   : > { %2410 = vmatmul.msk.bf16.gmra.mxu3 %vm882_vm0, %v3108_v54 }
 0x3e0   : > { %v1338_v22 = vpop.f32.mrf.mxu3 }
 0x3e1   : > { %1343 = vrot.lane.b32.xlu2 %v1338_v22, %s2712_s1 }
 0x3e8   : > { %v1340_v23 = vpop.f32.mrf.mxu3 }
 0x3f0   : > { %v1516_v26 = vpop.f32.mrf.mxu3 }
 0x3f1   : > { %v1618_v55 = vpack.c.bf16 %v1516_v26, %v1516_v26 }
 0x3f3   : > { %v1666_v57 = vunpack.c.l.b16 %v1618_v55 }
 0x3f8   : > { %v1518_v56 = vpop.f32.mrf.mxu3 }
 0x3f9   : > { %v1619_v44 = vpack.c.bf16 %v1518_v56, %v1518_v56 }
 0x3fb   : > { %v1667_v58 = vunpack.c.l.b16 %v1619_v44 }
 0x3fd   : > { %v3112_v59 = vpack.c.b16 %v1667_v58, %v1666_v57 }
 0x400   : > { %v1521_v60 = vpop.f32.mrf.mxu3 }
 0x401   : > { %v1620_v63 = vpack.c.bf16 %v1521_v60, %v1521_v60 }
 0x403   : > { %v1668_v3 = vunpack.c.l.b16 %v1620_v63 }
 0x408   : > { %v1523_v0 = vpop.f32.mrf.mxu3 }
 0x409   : > { %v1621_v4 = vpack.c.bf16 %v1523_v0, %v1523_v0 }
 0x40b   : > { %v1669_v5 = vunpack.c.l.b16 %v1621_v4 }
 0x40d   : > { %v3116_v6 = vpack.c.b16 %v1669_v5, %v1668_v3 }
 0x410   : > { %v1526_v7 = vpop.f32.mrf.mxu3 }
 0x411   : > { %v1622_v8 = vpack.c.bf16 %v1526_v7, %v1526_v7 }
 0x413   : > { %v1670_v10 = vunpack.c.l.b16 %v1622_v8 }
 0x418   : > { %v1528_v9 = vpop.f32.mrf.mxu3 }
 0x419   : > { %v1623_v11 = vpack.c.bf16 %v1528_v9, %v1528_v9 }
 0x41b   : > { %v1671_v12 = vunpack.c.l.b16 %v1623_v11 }
 0x41d   : > { %v3118_v13 = vpack.c.b16 %v1671_v12, %v1670_v10 }
 0x41f   : > { %v1700_v12 = vsel %vm1119_vm1, %v3118_v13, 0 }
 0x43b   : > { %v1344_v36 = vpop.permute.xlu2 %1343 }
 0x43c   : > { %v1346_v37 = vsel %vm1119_vm1, %v1228_v17, %v1344_v36  ;;  %v1382_v36 = vmul.f32 %v2572_v27, %v1381_v33 }
 0x43d   : > { %v1347_v38 = vpack.c.bf16 %v1346_v37, %v1346_v37 }
 0x43e   : > { %v1383_v30 = vadd.f32 %v2572_v27, %v1382_v36 }
 0x43f   : > { %2385 = vmatmul.msk.bf16.vlgmr.msra.gmra.mxu0 %vm882_vm0, %v1347_v38 }
 0x440   : > { %v3120_v50 = vsel %vm1384_vm2, %v2572_v27, %v1383_v30 }
 0x4bc   : > { %v1372_v34 = vpop.f32.mrf.mxu0 }
 0x4bd   : > { %v1373_v61 = vadd.f32 %v1372_v34, %v2910_v2  ;;  %v1531_v2 = vpop.f32.mrf.mxu3 }
 0x4be   : > { %v1624_v14 = vpack.c.bf16 %v1531_v2, %v1531_v2  ;;  %v1697_v2 = vsel %vm1119_vm1, %v3116_v6, 0 }
 0x4bf   : > { %v1376_v62 = vsel %vm882_vm0, %v1373_v61, 0.0 }
 0x4c0   : > { %1377 = vadd.xlane.f32.xlu1 %v1376_v62  ;;  %v1672_v16 = vunpack.c.l.b16 %v1624_v14  ;;  %v1694_v14 = vsel %vm1119_vm1, %v3112_v59, 0 }
 0x4c4   : > { %v1374_v1 = vpop.f32.mrf.mxu0 }
 0x4c5   : > { %v1533_v15 = vpop.f32.mrf.mxu3 }
 0x4c6   : > { %v1625_v17 = vpack.c.bf16 %v1533_v15, %v1533_v15  ;;  %v2486_v15 = vld [vmem:[%s3440_s10 + $0x8] sm:$0xff] }
 0x4c7   : > { %1463 = vmatpush.bf16.msrb.mxu0 %v2486_v15 }
 0x4c8   : > { %v1673_v18 = vunpack.c.l.b16 %v1625_v17 }
 0x4ca   : > { %v1685_v20 = vpack.c.b16 %v1673_v18, %v1672_v16  ;;  %v2485_v16 = vld [vmem:[%s3440_s10] sm:$0xff] }
 0x4cb   : > { %1464 = vmatpush.bf16.msrb.mxu0 %v2485_v16 }
 0x4cc   : > { %v1703_v11 = vsel %vm1119_vm1, %v1685_v20, 0 }
 0x4cd   : > { %v1536_v21 = vpop.f32.mrf.mxu3 }
 0x4ce   : > { %v1626_v38 = vpack.c.bf16 %v1536_v21, %v1536_v21 }
 0x4d0   : > { %v1674_v47 = vunpack.c.l.b16 %v1626_v38 }
 0x4d5   : > { %v1538_v22 = vpop.f32.mrf.mxu3 }
 0x4d6   : > { %v1627_v39 = vpack.c.bf16 %v1538_v22, %v1538_v22 }
 0x4d8   : > { %v1675_v48 = vunpack.c.l.b16 %v1627_v39 }
 0x4da   : > { %v1686_v55 = vpack.c.b16 %v1675_v48, %v1674_v47 }
 0x4dc   : > { %v1706_v10 = vsel %vm1119_vm1, %v1686_v55, 0 }
 0x4dd   : > { %v1541_v23 = vpop.f32.mrf.mxu3 }
 0x4de   : > { %v1628_v63 = vpack.c.bf16 %v1541_v23, %v1541_v23 }
 0x4e0   : > { %v1676_v4 = vunpack.c.l.b16 %v1628_v63 }
 0x4e5   : > { %v1543_v25 = vpop.f32.mrf.mxu3 }
 0x4e6   : > { %v1629_v0 = vpack.c.bf16 %v1543_v25, %v1543_v25 }
 0x4ed   : > { %v1546_v32 = vpop.f32.mrf.mxu3 }
 0x4ee   : > { %v1630_v37 = vpack.c.bf16 %v1546_v32, %v1546_v32 }
 0x4f0   : > { %v1678_v41 = vunpack.c.l.b16 %v1630_v37  ;;  %v2555_v37 = vld [vmem:[%s3441_s26] ss:$0 sm:$0xff] }
 0x4f5   : > { %v1548_v40 = vpop.f32.mrf.mxu3 }
 0x4f6   : > { %v1631_v43 = vpack.c.bf16 %v1548_v40, %v1548_v40  ;;  %v2556_v40 = vld [vmem:[%s3442_s9] ss:$0 sm:$0xff]  ;;  %s2607_s9 = scalar_lea.hbm %s3382_s23, 32 }
 0x4f8   : > { %v1679_v45 = vunpack.c.l.b16 %v1631_v43 }
 0x4fa   : > { %v1688_v51 = vpack.c.b16 %v1679_v45, %v1678_v41 }
 0x4fc   : > { %1819 = vrot.lane.b32.xlu1 %v1688_v51, %s3439_s21  ;;  %v1712_v8 = vsel %vm1119_vm1, %v1688_v51, 0 }
 0x4fd   : > { %v1551_v26 = vpop.f32.mrf.mxu3 }
 0x4fe   : > { %v1632_v44 = vpack.c.bf16 %v1551_v26, %v1551_v26 }
 0x500   : > { %v1680_v34 = vunpack.c.l.b16 %v1632_v44 }
 0x504   : > { %1811 = vrot.lane.b32.xlu1 %v3118_v13, %s3439_s21  ;;  %v2490_v13 = vld [vmem:[%s3371_s12 + $0x8] sm:$0xff] }
 0x505   : > { %v1553_v60 = vpop.f32.mrf.mxu3  ;;  %1574 = vmatpush.bf16.msra.mxu0 %v2490_v13 }
 0x506   : > { %v1633_v62 = vpack.c.bf16 %v1553_v60, %v1553_v60 }
 0x508   : > { %v1681_v1 = vunpack.c.l.b16 %v1633_v62 }
 0x50a   : > { %v1689_v3 = vpack.c.b16 %v1681_v1, %v1680_v34 }
 0x50c   : > { %1821 = vrot.lane.b32.xlu0 %v1689_v3, %s3439_s21  ;;  %v1715_v5 = vsel %vm1119_vm1, %v1689_v3, 0  ;;  %1807 = vrot.lane.b32.xlu1 %v3112_v59, %s3439_s21  ;;  %v2489_v59 = vld [vmem:[%s3371_s12] sm:$0xff] }
 0x50d   : > { %1717 = vmatpush.bf16.xpose.msrb.mxu1 %v1715_v5  ;;  %1575 = vmatpush.bf16.msra.mxu0 %v2489_v59 }
 0x515   : > { %1718 = vmatpush.bf16.xpose.msrb.mxu1 %v1712_v8 }
 0x533   : > { %v1378_v53 = vpop.xlane.xlu1 %1377 }
 0x534   : > { %v1386_v19 = vmul.f32 %v3120_v50, %v1378_v53 }
 0x536   : > { %v3124_v56 = vsub.f32 %v1373_v61, %v1386_v19  ;;  %v1677_v61 = vunpack.c.l.b16 %v1629_v0 }
 0x538   : > { %v1388_v57 = vmul.f32 %v3124_v56, %v3124_v56  ;;  %v1687_v7 = vpack.c.b16 %v1677_v61, %v1676_v4 }
 0x53a   : > { %v1389_v58 = vsel %vm882_vm0, %v1388_v57, 0.0  ;;  %1817 = vrot.lane.b32.xlu0 %v1687_v7, %s3439_s21  ;;  %v1709_v9 = vsel %vm1119_vm1, %v1687_v7, 0 }
 0x53b   : > { %1390 = vadd.xlane.f32.xlu2 %v1389_v58  ;;  %1719 = vmatpush.bf16.xpose.msrb.mxu1 %v1709_v9 }
 0x542   : > { %1813 = vrot.lane.b32.xlu0 %v1685_v20, %s3439_s21 }
 0x543   : > { %1720 = vmatpush.bf16.xpose.msrb.mxu1 %v1706_v10 }
 0x54a   : > { %1809 = vrot.lane.b32.xlu0 %v3116_v6, %s3439_s21 }
 0x54b   : > { %1721 = vmatpush.bf16.xpose.msrb.mxu1 %v1703_v11 }
 0x553   : > { %1815 = vrot.lane.b32.xlu2 %v1686_v55, %s3439_s21  ;;  %1722 = vmatpush.bf16.xpose.msrb.mxu1 %v1700_v12 }
 0x55b   : > { %1723 = vmatpush.bf16.xpose.msrb.mxu1 %v1697_v2 }
 0x563   : > { %1724 = vmatpush.bf16.xpose.msrb.mxu1 %v1694_v14 }
 0x56e   : > { %v1820_v23 = vpop.permute.xlu1 %1819 }
 0x56f   : > { %v1845_v27 = vsel %vm1119_vm1, %v1820_v23, 0 }
 0x576   : > { %v1812_v19 = vpop.permute.xlu1 %1811 }
 0x577   : > { %v1833_v26 = vsel %vm1119_vm1, %v1812_v19, 0 }
 0x57e   : > { %v1822_v20 = vpop.permute.xlu0 %1821  ;;  %v1808_v57 = vpop.permute.xlu1 %1807 }
 0x57f   : > { %v1848_v21 = vsel %vm1119_vm1, %v1822_v20, 0  ;;  %v1827_v44 = vsel %vm1119_vm1, %v1808_v57, 0 }
 0x580   : > { %1850 = vmatpush.bf16.xpose.msra.mxu1 %v1848_v21 }
 0x588   : > { %1851 = vmatpush.bf16.xpose.msra.mxu1 %v1845_v27 }
 0x5ac   : > { %v1818_v33 = vpop.permute.xlu0 %1817 }
 0x5ad   : > { %v1842_v39 = vsel %vm1119_vm1, %v1818_v33, 0 }
 0x5ae   : > { %v1391_v6 = vpop.xlane.xlu2 %1390  ;;  %1852 = vmatpush.bf16.xpose.msra.mxu1 %v1842_v39 }
 0x5af   : > { %v1392_v17 = vmul.f32 %v1391_v6, %v3120_v50 }
 0x5b1   : > { %v1393_v18 = vadd.f32 1e-06, %v1392_v17 }
 0x5b3   : > { %2573 = vrsqrt.f32 %v1393_v18  ;;  %vm1400_vm4 = vweird.f32 %v1393_v18 }
 0x5b4   : > { %v1814_v51 = vpop.permute.xlu0 %1813 }
 0x5b5   : > { %v1836_v53 = vsel %vm1119_vm1, %v1814_v51, 0 }
 0x5b6   : > { %v1816_v45 = vpop.permute.xlu2 %1815 }
 0x5b7   : > { %v1839_v48 = vsel %vm1119_vm1, %v1816_v45, 0 }
 0x5b8   : > { %1853 = vmatpush.bf16.xpose.msra.mxu1 %v1839_v48 }
 0x5b9   : > { %v2574_v22 = vpop.eup %2573 }
 0x5ba   : > { %v1395_v24 = vmul.f32 %v2574_v22, %v1393_v18  ;;  %vm1401_vm3 = vweird.f32 %v2574_v22 }
 0x5bb   : > { %vm1402_vm5 = vmor %vm1400_vm4, %vm1401_vm3 }
 0x5bc   : > { %v1396_v25 = vmul.f32 %v2574_v22, %v1395_v24  ;;  %v1810_v55 = vpop.permute.xlu0 %1809 }
 0x5be   : > { %v1397_v29 = vmul.f32 0.5, %v1396_v25 }
 0x5c0   : > { %v1398_v32 = vsub.f32 1.5, %v1397_v29  ;;  %1854 = vmatpush.bf16.xpose.msra.mxu1 %v1836_v53  ;;  %v1413_v29 = vld [vmem:[%s807_s0] sm:$0xf]  ;;  %s3287_s0 = scalar_lea.sflag [#allocation5], %s2107_s28 }
 0x5c2   : > { %v1399_v36 = vmul.f32 %v2574_v22, %v1398_v32  ;;  %v1414_v32 = vunpack.c.l.bf16 %v1413_v29 }
 0x5c4   : > { %v1403_v38 = vsel %vm1402_vm5, %v2574_v22, %v1399_v36 }
 0x5c5   : > { %v1404_v30 = vmul.f32 %v1403_v38, %v3124_v56  ;;  %v1830_v56 = vsel %vm1119_vm1, %v1810_v55, 0 }
 0x5c7   : > { %v1408_v41 = vmul.f32 %v2555_v37, %v1404_v30 }
 0x5c8   : > { %1855 = vmatpush.bf16.xpose.msra.mxu1 %v1833_v26 }
 0x5c9   : > { %v3173_v43 = vadd.f32 %v2556_v40, %v1408_v41 }
 0x5cb   : > { %v1433_v47 = vpack.c.bf16 %v3173_v43, %v3173_v43 }
 0x5cd   : > { %2394 = vmatmul.msk.bf16.vlgmr.msrb.gmra.mxu0 %vm882_vm0, %v1433_v47 }
 0x5d0   : > { %1856 = vmatpush.bf16.xpose.msra.mxu1 %v1830_v56 }
 0x5d8   : > { %1857 = vmatpush.bf16.xpose.msra.mxu1 %v1827_v44 }
 0x5dd   : > { %2419 = vmatmul.msk.bf16.vlgmr.msra.gmra.mxu0 %vm882_vm0, %v3064_v31 }
 0x5ed   : > { %2420 = vmatmul.msk.bf16.gmra.mxu0 %vm882_vm0, %v3070_v35 }
 0x5fd   : > { %2421 = vmatmul.msk.bf16.gmra.mxu0 %vm882_vm0, %v3078_v28 }
 0x60d   : > { %2422 = vmatmul.msk.bf16.gmra.mxu0 %vm882_vm0, %v3084_v42 }
 0x61d   : > { %2423 = vmatmul.msk.bf16.gmra.mxu0 %vm882_vm0, %v3090_v46 }
 0x62d   : > { %2424 = vmatmul.msk.bf16.gmra.mxu0 %vm882_vm0, %v3096_v49 }
 0x63d   : > { %2425 = vmatmul.msk.bf16.gmra.mxu0 %vm882_vm0, %v3102_v52 }
 0x64a   : > { %v1466_v31 = vpop.f32.mrf.mxu0 }
 0x64b   : > { %v1470_v58 = vmul.f32 0.25, %v1466_v31 }
 0x64d   : > { %v1617_v60 = vpack.c.bf16 %v1470_v58, %v1470_v58  ;;  %2426 = vmatmul.msk.bf16.gmra.mxu0 %vm882_vm0, %v3108_v54 }
 0x64f   : > { %v1803_v35 = vunpack.c.l.b16 %v1617_v60  ;;  %2427 = vmatmul.msk.bf16.vlgmr.msrb.gmra.mxu1 %vm1119_vm1, %v1617_v60 }
 0x651   : > { %v1804_v28 = vpack.c.b16 %v1803_v35, %v1803_v35 }
 0x652   : > { %v1468_v42 = vpop.f32.mrf.mxu0 }
 0x653   : > { %1805 = vrot.lane.b32.xlu0 %v1804_v28, %s3439_s21 }
 0x65a   : > { %v1577_v46 = vpop.f32.mrf.mxu0 }
 0x65b   : > { %v1634_v34 = vpack.c.bf16 %v1577_v46, %v1577_v46 }
 0x65d   : > { %v1757_v49 = vunpack.c.l.b16 %v1634_v34 }
 0x662   : > { %v1579_v62 = vpop.f32.mrf.mxu0 }
 0x663   : > { %v1635_v63 = vpack.c.bf16 %v1579_v62, %v1579_v62 }
 0x665   : > { %v1758_v0 = vunpack.c.l.b16 %v1635_v63 }
 0x667   : > { %v3201_v52 = vpack.c.b16 %v1758_v0, %v1757_v49 }
 0x66a   : > { %v1582_v1 = vpop.f32.mrf.mxu0 }
 0x66b   : > { %v1636_v3 = vpack.c.bf16 %v1582_v1, %v1582_v1 }
 0x66d   : > { %v1759_v61 = vunpack.c.l.b16 %v1636_v3 }
 0x672   : > { %v1584_v4 = vpop.f32.mrf.mxu0 }
 0x673   : > { %v1637_v54 = vpack.c.bf16 %v1584_v4, %v1584_v4 }
 0x675   : > { %v1760_v5 = vunpack.c.l.b16 %v1637_v54 }
 0x677   : > { %v3203_v7 = vpack.c.b16 %v1760_v5, %v1759_v61 }
 0x67a   : > { %v1587_v8 = vpop.f32.mrf.mxu0 }
 0x67b   : > { %v1638_v9 = vpack.c.bf16 %v1587_v8, %v1587_v8 }
 0x67d   : > { %v1761_v11 = vunpack.c.l.b16 %v1638_v9 }
 0x682   : > { %v1589_v10 = vpop.f32.mrf.mxu0 }
 0x683   : > { %v1639_v12 = vpack.c.bf16 %v1589_v10, %v1589_v10 }
 0x685   : > { %v1762_v2 = vunpack.c.l.b16 %v1639_v12 }
 0x687   : > { %v1775_v14 = vpack.c.b16 %v1762_v2, %v1761_v11 }
 0x68a   : > { %v1592_v15 = vpop.f32.mrf.mxu0 }
 0x68b   : > { %v1640_v16 = vpack.c.bf16 %v1592_v15, %v1592_v15 }
 0x68d   : > { %v1763_v6 = vunpack.c.l.b16 %v1640_v16 }
 0x692   : > { %v1594_v13 = vpop.f32.mrf.mxu0 }
 0x693   : > { %v1641_v17 = vpack.c.bf16 %v1594_v13, %v1594_v13 }
 0x695   : > { %v1764_v59 = vunpack.c.l.b16 %v1641_v17 }
 0x697   : > { %v1776_v18 = vpack.c.b16 %v1764_v59, %v1763_v6 }
 0x69a   : > { %v1597_v20 = vpop.f32.mrf.mxu0 }
 0x69b   : > { %v1642_v55 = vpack.c.bf16 %v1597_v20, %v1597_v20 }
 0x69d   : > { %v1765_v60 = vunpack.c.l.b16 %v1642_v55 }
 0x6a2   : > { %v1599_v21 = vpop.f32.mrf.mxu0 }
 0x6a3   : > { %v1643_v56 = vpack.c.bf16 %v1599_v21, %v1599_v21  ;;  %v2492_v21 = vld [vmem:[%s3372_s13 + $0x8] sm:$0xff] }
 0x6a5   : > { %v1766_v35 = vunpack.c.l.b16 %v1643_v56 }
 0x6a7   : > { %v1777_v42 = vpack.c.b16 %v1766_v35, %v1765_v60  ;;  %v2557_v60 = vld [vmem:[%s3373_s14] ss:$0 sm:$0xff] }
 0x6aa   : > { %v1602_v22 = vpop.f32.mrf.mxu0 }
 0x6ab   : > { %v1644_v47 = vpack.c.bf16 %v1602_v22, %v1602_v22  ;;  %v2491_v22 = vld [vmem:[%s3372_s13] sm:$0xff] }
 0x6ad   : > { %v1767_v44 = vunpack.c.l.b16 %v1644_v47  ;;  %v2498_v47 = vld [vmem:[%s3377_s18 + $0x18] sm:$0xff] }
 0x6ae   : > { %2059 = vmatpush.bf16.msrb.mxu1 %v2498_v47 }
 0x6b2   : > { %v1604_v23 = vpop.f32.mrf.mxu0 }
 0x6b3   : > { %v1645_v51 = vpack.c.bf16 %v1604_v23, %v1604_v23 }
 0x6b5   : > { %v1768_v31 = vunpack.c.l.b16 %v1645_v51 }
 0x6b7   : > { %v1778_v28 = vpack.c.b16 %v1768_v31, %v1767_v44 }
 0x6ba   : > { %v1607_v24 = vpop.f32.mrf.mxu0 }
 0x6bb   : > { %v1646_v39 = vpack.c.bf16 %v1607_v24, %v1607_v24 }
 0x6bd   : > { %v1769_v53 = vunpack.c.l.b16 %v1646_v39 }
 0x6c2   : > { %v1609_v25 = vpop.f32.mrf.mxu0 }
 0x6c3   : > { %v1647_v40 = vpack.c.bf16 %v1609_v25, %v1609_v25 }
 0x6c5   : > { %v1806_v27 = vpop.permute.xlu0 %1805  ;;  %v1770_v19 = vunpack.c.l.b16 %v1647_v40 }
 0x6c6   : > { %2428 = vmatmul.msk.bf16.vlgmr.msra.gmra.mxu1 %vm1119_vm1, %v1806_v27 }
 0x6c7   : > { %v1779_v58 = vpack.c.b16 %v1770_v19, %v1769_v53  ;;  %v2497_v53 = vld [vmem:[%s3377_s18 + $0x10] sm:$0xff] }
 0x6c8   : > { %2060 = vmatpush.bf16.msrb.mxu1 %v2497_v53 }
 0x6ca   : > { %v1612_v33 = vpop.f32.mrf.mxu0 }
 0x6cb   : > { %v1648_v38 = vpack.c.bf16 %v1612_v33, %v1612_v33 }
 0x6cc   : > { %v1726_v36 = vpop.f32.mrf.mxu1 }
 0x6cd   : > { %v1727_v37 = vadd.f32 %v1726_v36, %v1414_v32  ;;  %v1771_v41 = vunpack.c.l.b16 %v1648_v38 }
 0x6cf   : > { %1730 = vmax.xlane.f32.xlu1 %v1727_v37 }
 0x6d2   : > { %v1614_v30 = vpop.f32.mrf.mxu0 }
 0x6d3   : > { %v1649_v45 = vpack.c.bf16 %v1614_v30, %v1614_v30 }
 0x6d4   : > { %v1728_v48 = vpop.f32.mrf.mxu1 }
 0x6d5   : > { %v1772_v26 = vunpack.c.l.b16 %v1649_v45  ;;  %v2494_v45 = vld [vmem:[%s3375_s16 + $0x8] sm:$0xff] }
 0x6d7   : > { %v1780_v57 = vpack.c.b16 %v1772_v26, %v1771_v41  ;;  %v2496_v26 = vld [vmem:[%s3377_s18 + $0x8] sm:$0xff] }
 0x6d8   : > { %2061 = vmatpush.bf16.msrb.mxu1 %v2496_v26 }
 0x6d9   : > { %1789 = vmatpush.bf16.msra.mxu2 %v1780_v57  ;;  %1889 = vrot.lane.b32.xlu0 %v1780_v57, %s3439_s21 }
 0x6dd   : > { %1790 = vmatpush.bf16.msra.mxu2 %v1779_v58 }
 0x6e1   : > { %1791 = vmatpush.bf16.msra.mxu2 %v1778_v28  ;;  %1883 = vrot.lane.b32.xlu0 %v1777_v42, %s3439_s21 }
 0x6e5   : > { %1792 = vmatpush.bf16.msra.mxu2 %v1777_v42 }
 0x6e8   : > { %1887 = vrot.lane.b32.xlu1 %v1779_v58, %s3439_s21 }
 0x6e9   : > { %1793 = vmatpush.bf16.msra.mxu2 %v1776_v18 }
 0x6ed   : > { %1794 = vmatpush.bf16.msra.mxu2 %v1775_v14 }
 0x6f0   : > { %1881 = vrot.lane.b32.xlu1 %v1776_v18, %s3439_s21 }
 0x6f1   : > { %1795 = vmatpush.bf16.msra.mxu2 %v3203_v7 }
 0x6f5   : > { %1796 = vmatpush.bf16.msra.mxu2 %v3201_v52 }
 0x6f8   : > { %1879 = vrot.lane.b32.xlu1 %v1775_v14, %s3439_s21 }
 0x700   : > { %1875 = vrot.lane.b32.xlu1 %v3201_v52, %s3439_s21 }
 0x742   : > { %v1731_v46 = vpop.xlane.xlu1 %1730 }
 0x743   : > { %v1732_v34 = vsub.f32 %v1727_v37, %v1731_v46  ;;  %v1859_v62 = vpop.f32.mrf.mxu1 }
 0x744   : > { %v1860_v49 = vadd.f32 %v1859_v62, %v1414_v32 }
 0x745   : > { %v1733_v63 = vmul.f32 1.442695, %v1732_v34 }
 0x746   : > { %1863 = vmax.xlane.f32.xlu2 %v1860_v49 }
 0x747   : > { %2575 = vpow2.f32 %v1733_v63  ;;  %v2559_v63 = vld [vmem:[%s3376_s17] ss:$0 sm:$0xff] }
 0x74b   : > { %v1861_v0 = vpop.f32.mrf.mxu1  ;;  %v1890_v3 = vpop.permute.xlu0 %1889 }
 0x74c   : > { %1899 = vmatpush.bf16.msrb.mxu2 %v1890_v3 }
 0x74d   : > { %v2576_v1 = vpop.eup %2575 }
 0x74e   : > { %1735 = vadd.xlane.f32.xlu0 %v2576_v1 }
 0x753   : > { %v1884_v52 = vpop.permute.xlu0 %1883 }
 0x75a   : > { %v1888_v4 = vpop.permute.xlu1 %1887 }
 0x75b   : > { %1900 = vmatpush.bf16.msrb.mxu2 %v1888_v4 }
 0x75e   : > { %1885 = vrot.lane.b32.xlu2 %v1778_v28, %s3439_s21  ;;  %v2558_v28 = vld [vmem:[%s3374_s15] ss:$0 sm:$0xff] }
 0x762   : > { %1877 = vrot.lane.b32.xlu0 %v3203_v7, %s3439_s21  ;;  %v1882_v10 = vpop.permute.xlu1 %1881  ;;  %s2603_s21 = scalar_lea.hbm %s2602_s2, 16 }
 0x763   : > { %p2604_p11 = scmp.ne.s32.totalorder %s2602_s2, %s2603_s21  ;;  %p2609_p1 = scmp.lt.s32.totalorder %s2607_s9, %s2603_s21 }
 0x765   : > { %p2605_p12 = pnand %p2604_p11, %p2881_p5  ;;  %p2610_p2 = por %p2609_p1, %p2608_p0 }
 0x767   : > { %p2606_p13 = pneg %p2605_p12 }
 0x769   : > { %p2611_p3 = pnand %p2610_p2, %p2606_p13 }
 0x76a   : > { %v1880_v14 = vpop.permute.xlu1 %1879 }
 0x772   : > { %v1876_v16 = vpop.permute.xlu1 %1875 }
 0x7b9   : > { %v1864_v61 = vpop.xlane.xlu2 %1863 }
 0x7ba   : > { %v1865_v54 = vsub.f32 %v1860_v49, %v1864_v61  ;;  %v2495_v49 = vld [vmem:[%s3377_s18] sm:$0xff] }
 0x7bb   : > { %2062 = vmatpush.bf16.msrb.mxu1 %v2495_v49  ;;  %v2560_v61 = vld [vmem:[%s3378_s19] ss:$0 sm:$0xff] }
 0x7bc   : > { %v1866_v5 = vmul.f32 1.442695, %v1865_v54 }
 0x7be   : > { %2577 = vpow2.f32 %v1866_v5 }
 0x7c1   : > { %v1886_v8 = vpop.permute.xlu2 %1885  ;;  %v1736_v9 = vpop.xlane.xlu0 %1735 }
 0x7c2   : > { %2579 = vrcp.f32 %v1736_v9  ;;  %1901 = vmatpush.bf16.msrb.mxu2 %v1886_v8 }
 0x7c4   : > { %v2578_v11 = vpop.eup %2577 }
 0x7c5   : > { %1868 = vadd.xlane.f32.xlu2 %v2578_v11 }
 0x7c6   : > { %1902 = vmatpush.bf16.msrb.mxu2 %v1884_v52 }
 0x7c8   : > { %v2580_v12 = vpop.eup %2579 }
 0x7c9   : > { %v1738_v2 = vmul.f32 %v2580_v12, %v2576_v1 }
 0x7ca   : > { %1903 = vmatpush.bf16.msrb.mxu2 %v1882_v10 }
 0x7cb   : > { %1739 = vst [vmem:[%s3225_s22] sm:$0xff] %v1738_v2  ;;  %v1740_v7 = vpack.c.bf16 %v1738_v2, %v1738_v2 }
 0x7cd   : > { %1797 = vmatmul.bf16.vlgmr.msra.gmra.mxu2 %v1740_v7 }
 0x7ce   : > { %1904 = vmatpush.bf16.msrb.mxu2 %v1880_v14 }
 0x7d4   : > { %v1878_v15 = vpop.permute.xlu0 %1877 }
 0x7d5   : > { %1905 = vmatpush.bf16.msrb.mxu2 %v1878_v15 }
 0x7d9   : > { %1906 = vmatpush.bf16.msrb.mxu2 %v1876_v16 }
 0x7dd   : > { %1939 = vmatpush.bf16.msra.mxu2 %v2492_v21 }
 0x7e1   : > { %1940 = vmatpush.bf16.msra.mxu2 %v2491_v22 }
 0x838   : > { %v1869_v13 = vpop.xlane.xlu2 %1868 }
 0x839   : > { %2581 = vrcp.f32 %v1869_v13 }
 0x83f   : > { %v2582_v6 = vpop.eup %2581 }
 0x840   : > { %v1871_v17 = vmul.f32 %v2582_v6, %v2578_v11 }
 0x842   : > { %2429 = vst [vmem:[%s3225_s22 + $0x8] sm:$0xff] %v1871_v17  ;;  %v1874_v59 = vpack.c.bf16 %v1871_v17, %v1871_v17 }
 0x844   : > { %1907 = vmatmul.bf16.vlgmr.msrb.gmra.mxu2 %v1874_v59 }
 0x845   : > { %2006 = vmatpush.bf16.msrb.mxu2 %v2494_v45 }
 0x850   : > { %v1798_v18 = vpop.f32.mrf.mxu2 }
 0x858   : > { %v1800_v20 = vpop.f32.mrf.mxu2 }
 0x8c7   : > { %v1908_v23 = vpop.f32.mrf.mxu2 }
 0x8c8   : > { %1913 = vrot.lane.b32.xlu0 %v1908_v23, %s2712_s1 }
 0x8cf   : > { %v1910_v24 = vpop.f32.mrf.mxu2 }
 0x93a   : > { %v1914_v25 = vpop.permute.xlu0 %1913 }
 0x93b   : > { %v1916_v27 = vsel %vm1119_vm1, %v1798_v18, %v1914_v25 }
 0x93c   : > { %v1917_v29 = vpack.c.bf16 %v1916_v27, %v1916_v27 }
 0x93e   : > { %2438 = vmatmul.msk.bf16.vlgmr.msra.gmra.mxu2 %vm882_vm0, %v1917_v29 }
 0x9c1   : > { %v1942_v32 = vpop.f32.mrf.mxu2 }
 0x9c2   : > { %v1943_v33 = vadd.f32 %v1942_v32, %v3173_v43  ;;  %v2493_v43 = vld [vmem:[%s3375_s16] sm:$0xff] }
 0x9c3   : > { %2007 = vmatpush.bf16.msrb.mxu2 %v2493_v43 }
 0x9c4   : > { %v1946_v36 = vsel %vm882_vm0, %v1943_v33, 0.0 }
 0x9c5   : > { %1947 = vadd.xlane.f32.xlu1 %v1946_v36 }
 0x9c9   : > { %v1944_v37 = vpop.f32.mrf.mxu2 }
 0xa38   : > { %v1948_v38 = vpop.xlane.xlu1 %1947 }
 0xa39   : > { %v1949_v39 = vmul.f32 %v1948_v38, %v3120_v50 }
 0xa3b   : > { %v1950_v40 = vsub.f32 %v1943_v33, %v1949_v39 }
 0xa3d   : > { %v1951_v30 = vmul.f32 %v1950_v40, %v1950_v40 }
 0xa3f   : > { %v1952_v41 = vsel %vm882_vm0, %v1951_v30, 0.0 }
 0xa40   : > { %1953 = vadd.xlane.f32.xlu0 %v1952_v41 }
 0xab3   : > { %v1954_v48 = vpop.xlane.xlu0 %1953 }
 0xab4   : > { %v1955_v51 = vmul.f32 %v1954_v48, %v3120_v50 }
 0xab6   : > { %v1956_v19 = vadd.f32 1e-06, %v1955_v51 }
 0xab8   : > { %2583 = vrsqrt.f32 %v1956_v19  ;;  %vm1963_vm7 = vweird.f32 %v1956_v19 }
 0xabe   : > { %v2584_v55 = vpop.eup %2583 }
 0xabf   : > { %v1958_v56 = vmul.f32 %v2584_v55, %v1956_v19  ;;  %vm1964_vm6 = vweird.f32 %v2584_v55 }
 0xac0   : > { %vm1965_vm8 = vmor %vm1963_vm7, %vm1964_vm6 }
 0xac1   : > { %v1959_v57 = vmul.f32 %v2584_v55, %v1958_v56 }
 0xac3   : > { %v1960_v44 = vmul.f32 0.5, %v1959_v57 }
 0xac5   : > { %v1961_v31 = vsub.f32 1.5, %v1960_v44 }
 0xac7   : > { %v1962_v58 = vmul.f32 %v2584_v55, %v1961_v31 }
 0xac9   : > { %v1966_v35 = vsel %vm1965_vm8, %v2584_v55, %v1962_v58 }
 0xaca   : > { %v1967_v42 = vmul.f32 %v1966_v35, %v1950_v40 }
 0xacc   : > { %v1971_v46 = vmul.f32 %v2557_v60, %v1967_v42 }
 0xace   : > { %v1975_v34 = vadd.f32 %v2558_v28, %v1971_v46 }
 0xad0   : > { %v1976_v62 = vpack.c.bf16 %v1975_v34, %v1975_v34 }
 0xad2   : > { %2447 = vmatmul.msk.bf16.vlgmr.msrb.gmra.mxu2 %vm882_vm0, %v1976_v62 }
 0xb55   : > { %v2009_v0 = vpop.f32.mrf.mxu2 }
 0xb56   : > { %v2010_v1 = vadd.f32 %v2559_v63, %v2009_v0 }
 0xb58   : > { %v2013_v3 = vmax.f32 %v2010_v1, 0.0 }
 0xb5a   : > { %v2014_v4 = vpack.c.bf16 %v2013_v3, %v2013_v3 }
 0xb5c   : > { %2464 = vmatmul.msk.bf16.vlgmr.msrb.gmra.mxu1 %vm2051_vm9, %v2014_v4 }
 0xb5d   : > { %v2011_v52 = vpop.f32.mrf.mxu2 }
 0xbd9   : > { %v2064_v54 = vpop.f32.mrf.mxu1 }
 0xbda   : > { %v2065_v5 = vadd.f32 %v2560_v61, %v2064_v54 }
 0xbdc   : > { %v2068_v8 = vadd.f32 %v2065_v5, %v1975_v34 }
 0xbde   : > { %v2071_v9 = vsel %vm882_vm0, %v2068_v8, 0.0 }
 0xbdf   : > { %2072 = vadd.xlane.f32.xlu2 %v2071_v9 }
 0xbe1   : > { %v2066_v10 = vpop.f32.mrf.mxu1 }
 0xc52   : > { %v2073_v11 = vpop.xlane.xlu2 %2072 }
 0xc53   : > { %v2074_v12 = vmul.f32 %v2073_v11, %v3120_v50 }
 0xc55   : > { %v3276_v2 = vsub.f32 %v2068_v8, %v2074_v12 }
 0xc57   : > { %v2076_v7 = vmul.f32 %v3276_v2, %v3276_v2 }
 0xc59   : > { %v2077_v14 = vsel %vm882_vm0, %v2076_v7, 0.0 }
 0xc5a   : > { %2078 = vadd.xlane.f32.xlu2 %v2077_v14 }
 0xc5b   : > { %2614 = shalt.err (!%p2611_p3)
}
 0xc5c   : > { %s2714_s27 = smov 128   ;;  %s2715_s28 = smov 8  }
 0xc5d   : > { %2502 = dma.vmem_to_hbm [thread:$0]  (%p2881_p5), %s2140_s4, 256, %s2142_s30, %s3287_s0, %s2714_s27, %s2714_s27, %s2715_s28  }
 0xc5e   : > { %s2155_s8 = scalar_lea.hbm %s3383_s24, %s2499_s25  ;;  %s2156_s26 = sshll.u32 %s3225_s22, 4  ;;  %s2157_s26 = int_to_ptr.vmem [resolvable:$true] %s2156_s26 }
 0xc5f   : > { %s2158_s11 = sshll.u32 %s2155_s8, 4  ;;  %s2635_s1 = scalar_lea.hbm %s3383_s24, 32  ;;  %s2159_s11 = int_to_ptr.hbm [resolvable:$true] %s2158_s11 }
 0xc60   : > { %s2629_s9 = sshra.s32 %s2159_s11, 4  ;;  %s2630_s9 = int_to_ptr.hbm [resolvable:$true] %s2629_s9 }
 0xc61   : > { %s2631_s10 = scalar_lea.hbm %s2630_s9, 16  ;;  %p2636_p9 = scmp.lt.s32.totalorder %s2630_s9, %s3383_s24 }
 0xc62   : > { %p2632_p4 = scmp.ne.s32.totalorder %s2630_s9, %s2631_s10  ;;  %p2637_p10 = scmp.lt.s32.totalorder %s2635_s1, %s2631_s10 }
 0xc64   : > { %p2633_p7 = pnand %p2632_p4, %p2881_p5  ;;  %p2638_p11 = por %p2637_p10, %p2636_p9 }
 0xc66   : > { %p2634_p8 = pneg %p2633_p7 }
 0xc68   : > { %p2639_p12 = pnand %p2638_p11, %p2634_p8 }
 0xc6a   : > { %2642 = shalt.err (!%p2639_p12)
}
 0xc6b   : > { %2503 = dma.vmem_to_hbm [thread:$0]  (%p2881_p5), %s2157_s26, 256, %s2159_s11, %s3287_s0, %s2714_s27, %s2714_s27, %s2715_s28  }
 0xc6c   : > { %s2324_s22 = sshll.u32 %s3033_s5, 3  ;;  %s2468_s25 = sshll.u32 %s2862_s6, 3  ;;  %v2561_v22 = vld [vmem:[%s3379_s20] ss:$0 sm:$0xff] }
 0xc6d   : > { %s3446_s27 = sld [smem:[#allocation29_spill]]  ;;  %s775_s6 = scalar_lea.vmem [#allocation2], %s2324_s22 }
 0xc6e   : > { %s3448_s10 = sld [smem:[#allocation28_spill]]  ;;  %s2125_s2 = sshll.u32 %s775_s6, 4  ;;  %s2126_s2 = int_to_ptr.vmem [resolvable:$true] %s2125_s2 }
 0xc6f   : > { %s2103_s1 = scalar_lea.sflag [#allocation3], %s3033_s5 }
 0xc73   : > { %s3447_s8 = smov %s3446_s27  ;;  %s2123_s28 = scalar_lea.hbm %s3446_s27, %s2468_s25 }
 0xc74   : > { %v2562_v24 = vld [vmem:[%s3448_s10] ss:$0 sm:$0xff]  ;;  %s2127_s21 = sshll.u32 %s2123_s28, 4  ;;  %s2663_s22 = scalar_lea.hbm %s3447_s8, 16  ;;  %s2128_s21 = int_to_ptr.hbm [resolvable:$true] %s2127_s21 }
 0xc75   : > { %s2657_s4 = sshra.s32 %s2128_s21, 4  ;;  %s2658_s4 = int_to_ptr.hbm [resolvable:$true] %s2657_s4 }
 0xc76   : > { %s2659_s30 = scalar_lea.hbm %s2658_s4, 8  ;;  %p2664_p2 = scmp.lt.s32.totalorder %s2658_s4, %s3447_s8 }
 0xc77   : > { %p2660_p13 = scmp.ne.s32.totalorder %s2658_s4, %s2659_s30  ;;  %p2665_p3 = scmp.lt.s32.totalorder %s2663_s22, %s2659_s30 }
 0xc79   : > { %p2661_p0 = pnand %p2660_p13, %p2881_p5  ;;  %p2666_p4 = por %p2665_p3, %p2664_p2 }
 0xc7b   : > { %p2662_p1 = pneg %p2661_p0 }
 0xc7d   : > { %p2667_p7 = pnand %p2666_p4, %p2662_p1 }
 0xccd   : > { %v2079_v15 = vpop.xlane.xlu2 %2078 }
 0xcce   : > { %v2080_v16 = vmul.f32 %v2079_v15, %v3120_v50 }
 0xcd0   : > { %v2081_v13 = vadd.f32 1e-06, %v2080_v16 }
 0xcd2   : > { %2585 = vrsqrt.f32 %v2081_v13  ;;  %vm2088_vm11 = vweird.f32 %v2081_v13 }
 0xcd8   : > { %v2586_v6 = vpop.eup %2585 }
 0xcd9   : > { %v2083_v17 = vmul.f32 %v2586_v6, %v2081_v13  ;;  %vm2089_vm10 = vweird.f32 %v2586_v6 }
 0xcda   : > { %vm2090_vm12 = vmor %vm2088_vm11, %vm2089_vm10 }
 0xcdb   : > { %v2084_v59 = vmul.f32 %v2586_v6, %v2083_v17 }
 0xcdd   : > { %v2085_v18 = vmul.f32 0.5, %v2084_v59 }
 0xcdf   : > { %v2086_v20 = vsub.f32 1.5, %v2085_v18 }
 0xce1   : > { %v2087_v21 = vmul.f32 %v2586_v6, %v2086_v20 }
 0xce3   : > { %v2091_v50 = vsel %vm2090_vm12, %v2586_v6, %v2087_v21 }
 0xce4   : > { %v2092_v23 = vmul.f32 %v2091_v50, %v3276_v2 }
 0xce6   : > { %v2096_v25 = vmul.f32 %v2561_v22, %v2092_v23 }
 0xce8   : > { %v2100_v27 = vadd.f32 %v2562_v24, %v2096_v25 }
 0xcea   : > { %2101 = vst.msk [vmem:[%s775_s6] sm:$0xff] %vm882_vm0, %v2100_v27 }
 0xceb   : > { %2670 = shalt.err (!%p2667_p7)
}
 0xcec   : > { %2501 = dma.vmem_to_hbm [thread:$0]  (%p2881_p5), %s2126_s2, 128, %s2128_s21, %s2103_s1  }
 0xced PF: > { %s3449_s5 = sld [smem:[#allocation12_spill]] }
 0xcee   : > { %s3450_s0 = sld [smem:[#allocation9_spill]] }
 0xcf3   : > { %p2517_p8 = scmp.ge.s32.totalorder %s3449_s5, 2 }
 0xcf4   : > { %s2173_s28 = sand.u32 1, %s3450_s0  }
 0xcf5   : > { %p2508_p9 = pnand %p2517_p8, %p2885_p6  ;;  %s2174_s26 = scalar_lea.sflag [#allocation3], %s2173_s28 }
 0xcf7   : > { %p2509_p10 = pneg %p2508_p9 }
 0xcf9   : > { %2688 = dma.done.wait (%p2509_p10), %s2174_s26, 128  }
 0xcfa   : > { %2690 = vsyncadd (%p2509_p10), %s2174_s26, 4294967168  ;;  %s3452_s9 = sadd.s32 4294967294, %s3449_s5  }
 0xcfb   : > { %s2183_s10 = sand.u32 1, %s3452_s9  }
 0xcfc   : > { %s2184_s6 = scalar_lea.sflag [#allocation5], %s2183_s10 }
 0xcfd   : > { %2692 = dma.done.wait (%p2509_p10), %s2184_s6, 512  }
 0xcfe   : > { %2694 = vsyncadd (%p2509_p10), %s2184_s6, 4294966784  ;;  %s3453_s28 = sld [smem:[#allocation13_spill]] }
 0xcff   : > { %s3454_s5 = sld [smem:[#allocation10_spill]] }
 0xd00   : > { %s3455_s26 = sld [smem:[#allocation11_spill]] }
 0xd01   : > { %s3456_s27 = sld [smem:[#allocation14_spill]] }
 0xd04   : > { %p38_p5 = scmp.ge.s32.totalorder %s3453_s28, 4  }
 0xd06   :  { %40 = sbr.rel (!%p38_p5) target bundleno = 20 (0x14), region = 186 }
 0xd0b   :  { %2200 = vsyncpa [#allocation3], 1 }
 0xd0c   :  { %2202 = vsyncpa [#allocation3 + $0x1], 1 }
 0xd0d   :  { %2203 = vsyncpa [#allocation5], 1 }
 0xd0e   :  { %2205 = vsyncpa [#allocation5 + $0x1], 1 }

</bundles_post_ra>
